<compile_context>
chip_gen: v7x
topology: tpu7x:2x2x1
jax: 0.10.0
libtpu: 0.0.40
codegen_flags: <defaults>
</compile_context>

<pallas_src>
import jax
import jax.numpy as jnp
from jax.experimental import pallas as pl
from jax.experimental.pallas import tpu as pltpu

VMEM = pltpu.MemorySpace.VMEM
SMEM = pltpu.MemorySpace.SMEM


# -----------------------------------------------------------------------------
# Fused kernel: embedding gather + tanh + masked LSTM + classifier MLP.
# -----------------------------------------------------------------------------
def fused_vqa_kernel(tok_ref, qlen_ref, img_ref, emb_ref, wih_ref, whh_ref,
                     w1_hbm, b1_ref, w2_hbm, b2_ref,
                     out_ref, x_vmem, w1_vmem, w2_vmem, dma_sem):
    # tok_ref : (B, T) int32  token ids                      [SMEM]
    # qlen_ref: (B, 1) int32  valid lengths                  [VMEM]
    # img_ref : (B, CV) f32   image features (1x1 spatial flattened)
    # emb_ref : (V, 1, E) f32 embedding table (leading axis = vocab row)
    # wih_ref : (E, 4H) f32   input->gates  (i/f/o cols pre-scaled by 0.5)
    # whh_ref : (H, 4H) f32   hidden->gates (i/f/o cols pre-scaled by 0.5)
    # w1_hbm  : (CV+H, D1) f32 fused classifier W1           [HBM / ANY]
    # w2_hbm  : (D1, A) f32                                  [HBM / ANY]
    # out_ref : (B, A) f32
    B, T = tok_ref.shape
    H = whh_ref.shape[0]

    # ---- kick off classifier-weight DMAs; they finish behind the LSTM -------
    cp_w1 = pltpu.make_async_copy(w1_hbm, w1_vmem, dma_sem.at[0])
    cp_w2 = pltpu.make_async_copy(w2_hbm, w2_vmem, dma_sem.at[1])
    cp_w1.start()
    cp_w2.start()

    # ---- embedding lookup: scalar-indexed row gathers (tokens in SMEM) ------
    for t in range(T):                       # static unroll (T*B = 16 rows)
        for b in range(B):
            tok = tok_ref[b, t]              # scalar SMEM read
            x_vmem[pl.ds(t * B + b, 1), :] = emb_ref[tok]   # (1, E) row gather

    x_all = jnp.tanh(x_vmem[...])                                   # (T*B, E)

    # ---- input->gate projection for ALL timesteps, off the serial chain -----
    gates_x = jnp.dot(x_all, wih_ref[...],
                      preferred_element_type=jnp.float32)           # (T*B, 4H)

    # ---- length-masked LSTM recurrence (pack_padded_sequence semantics) -----
    whh = whh_ref[...]
    qlen_b = jnp.broadcast_to(qlen_ref[...], (B, H))   # hoisted broadcast
    h = jnp.zeros((B, H), jnp.float32)
    c = jnp.zeros((B, H), jnp.float32)
    for t in range(T):                       # static unroll; 1 matmul per step
        gates = (gates_x[t * B:(t + 1) * B, :] +
                 jnp.dot(h, whh, preferred_element_type=jnp.float32))  # (B,4H)
        # one wide tanh: sigmoid(x) = 0.5*tanh(0.5x)+0.5, 0.5 pre-folded into
        # the i/f/o weight columns; g column is plain tanh.
        tg = jnp.tanh(gates)
        i = 0.5 * tg[:, 0 * H:1 * H] + 0.5
        f = 0.5 * tg[:, 1 * H:2 * H] + 0.5
        g = tg[:, 2 * H:3 * H]
        o = 0.5 * tg[:, 3 * H:4 * H] + 0.5
        c_new = f * c + i * g
        h_new = o * jnp.tanh(c_new)
        # state only advances while t < q_len[b]; final c matches PyTorch c_n
        valid = t < qlen_b                                          # (B, H)
        h = jnp.where(valid, h_new, h)
        c = jnp.where(valid, c_new, c)
    ques = c                                                        # (B, H)

    # ---- attention branch: softmax over the 1x1 spatial axis == 1, so
    #      apply_attention(img, a) returns img for every glimpse; the v/q/x
    #      conv matmuls provably do not affect the output and are elided.
    cp_w1.wait()
    cp_w2.wait()
    img = img_ref[...]                                              # (B, CV)
    combined = jnp.concatenate([img, ques], axis=1)                 # (B, CV+H)
    h1 = jnp.maximum(
        jnp.dot(combined, w1_vmem[...], preferred_element_type=jnp.float32)
        + b1_ref[...], 0.0)                                         # (B, D1)
    out_ref[...] = (jnp.dot(h1, w2_vmem[...], preferred_element_type=jnp.float32)
                    + b2_ref[...])                                  # (B, A)


# -----------------------------------------------------------------------------
# Wrappers
# -----------------------------------------------------------------------------
def init_params(key, V, E, H, CV, MID, G, D1, A):
    ks = jax.random.split(key, 8)

    def w(k, shape, scale=0.05):
        return scale * jax.random.normal(k, shape, jnp.float32)

    return dict(
        emb=w(ks[0], (V, E)),                    # nn.Embedding weight
        lstm_wih=w(ks[1], (E, 4 * H)),           # weight_ih_l0^T  (i,f,g,o)
        lstm_whh=w(ks[2], (H, 4 * H)),           # weight_hh_l0^T  (biases zero)
        # Attention weights: mathematically dead for a 1x1 spatial map (kept
        # only so the param structure mirrors the PyTorch module).
        att_wv=w(ks[3], (CV, MID)),
        att_wq=w(ks[4], (H, MID)),
        att_bq=jnp.zeros((1, MID), jnp.float32),
        att_wx=w(ks[5], (MID, G)),
        att_bx=jnp.zeros((1, G), jnp.float32),
        cls_w1=w(ks[6], (G * CV + H, D1)),       # Linear(G*CV + H, D1)
        cls_b1=jnp.zeros((1, D1), jnp.float32),
        cls_w2=w(ks[7], (D1, A)),                # Linear(D1, A)
        cls_b2=jnp.zeros((1, A), jnp.float32),
    )


def prepare_inference_params(params, CV):
    """One-time weight folding (runs once, outside the kernel)."""
    V, E = params["emb"].shape
    H = params["lstm_whh"].shape[0]
    # Fold the 0.5 of sigmoid(x)=0.5*tanh(0.5x)+0.5 into the i/f/o gate
    # columns (gate order i,f,g,o); g keeps scale 1.  Applied to BOTH W_ih and
    # W_hh (LSTM biases are zero in this module, matching the PyTorch init).
    gate_scale = jnp.concatenate(
        [jnp.full((1, H), 0.5, jnp.float32),
         jnp.full((1, H), 0.5, jnp.float32),
         jnp.ones((1, H), jnp.float32),
         jnp.full((1, H), 0.5, jnp.float32)], axis=1)                 # (1, 4H)
    w1 = params["cls_w1"]
    # Both glimpses see img * 1 (softmax over size-1 axis), so the two glimpse
    # slices of W1 are summed; concatenate with the question slice so the
    # classifier's first layer is a single K=CV+H matmul.
    w1_fused = jnp.concatenate([w1[0:CV] + w1[CV:2 * CV], w1[2 * CV:]], axis=0)
    return dict(
        emb3d=params["emb"].reshape(V, 1, E),        # row-per-tile for gathers
        lstm_wih=params["lstm_wih"] * gate_scale,
        lstm_whh=params["lstm_whh"] * gate_scale,
        cls_w1=w1_fused,                             # (CV+H, D1)
        cls_b1=params["cls_b1"],
        cls_w2=params["cls_w2"],
        cls_b2=params["cls_b2"],
    )


def my_model_forward(prep, tokens, q_len, img_nchw):
    B, T = tokens.shape
    V, _, E = prep["emb3d"].shape
    A = prep["cls_w2"].shape[1]
    img = img_nchw.reshape(B, -1)                    # 1x1 spatial -> (B, CV)
    # Clamp token ids: an OOB id would be a silent OOB VMEM read in-kernel.
    tokens = jnp.clip(tokens.astype(jnp.int32), 0, V - 1)
    vspec = pl.BlockSpec(memory_space=VMEM)
    aspec = pl.BlockSpec(memory_space=pl.ANY)        # stays in HBM; manual DMA
    return pl.pallas_call(
        fused_vqa_kernel,
        out_shape=jax.ShapeDtypeStruct((B, A), jnp.float32),
        in_specs=[pl.BlockSpec(memory_space=SMEM),   # tokens
                  vspec,                             # q_len
                  vspec,                             # img
                  vspec,                             # embedding table
                  vspec,                             # lstm W_ih
                  vspec,                             # lstm W_hh
                  aspec,                             # classifier W1 (overlapped)
                  vspec,                             # b1
                  aspec,                             # classifier W2 (overlapped)
                  vspec],                            # b2
        out_specs=vspec,
        scratch_shapes=[pltpu.VMEM((T * B, E), jnp.float32),
                        pltpu.VMEM(prep["cls_w1"].shape, jnp.float32),
                        pltpu.VMEM(prep["cls_w2"].shape, jnp.float32),
                        pltpu.SemaphoreType.DMA((2,))],
    )(tokens,
      q_len.reshape(B, 1).astype(jnp.int32),
      img,
      prep["emb3d"], prep["lstm_wih"], prep["lstm_whh"],
      prep["cls_w1"], prep["cls_b1"], prep["cls_w2"], prep["cls_b2"])


def reference_forward(params, tokens, q_len, img_nchw):
    """Pure-JAX reference mirroring the PyTorch forward (unfolded params)."""
    B, T = tokens.shape
    H = params["lstm_whh"].shape[0]
    x = jnp.tanh(params["emb"][tokens])              # (B, T, E)
    h = jnp.zeros((B, H), jnp.float32)
    c = jnp.zeros((B, H), jnp.float32)
    for t in range(T):
        gates = x[:, t] @ params["lstm_wih"] + h @ params["lstm_whh"]
        i = jax.nn.sigmoid(gates[:, :H])
        f = jax.nn.sigmoid(gates[:, H:2 * H])
        g = jnp.tanh(gates[:, 2 * H:3 * H])
        o = jax.nn.sigmoid(gates[:, 3 * H:])
        c_new = f * c + i * g
        h_new = o * jnp.tanh(c_new)
        valid = (t < q_len)[:, None].astype(jnp.float32)
        h = valid * h_new + (1.0 - valid) * h
        c = valid * c_new + (1.0 - valid) * c
    img = img_nchw.reshape(B, -1)
    # softmax over 1x1 spatial -> each glimpse = img
    combined = jnp.concatenate([img, img, c], axis=1)
    h1 = jnp.maximum(combined @ params["cls_w1"] + params["cls_b1"], 0.0)
    return h1 @ params["cls_w2"] + params["cls_b2"]


if __name__ == "__main__":
    # TODO(synk): the unused img_encoder (ResNetClassifier) branch is not
    # implemented; Dropout/Dropout2d are identity (eval mode).
    B, T = 2, 8                 # forward hard-codes batch = 2 via torch.rand((2, ...))
    V, E, H = 200, 64, 128      # vocab, embedding_features, lstm_features
    CV, MID, G = 256, 64, 2     # v_features, mid_features, glimpses
    D1, A = 128, 256            # classifier hidden, num answers

    key = jax.random.PRNGKey(0)
    k_p, k_tok, k_img = jax.random.split(key, 3)

    params = init_params(k_p, V, E, H, CV, MID, G, D1, A)
    prep = prepare_inference_params(params, CV)

    ques_tokens = jax.random.randint(k_tok, (B, T), 1, V)          # (B, T)
    q_len = jnp.array([T, 5], dtype=jnp.int32)                     # (B,)
    assert int(q_len.min()) >= 1, "pack_padded_sequence requires lengths >= 1"
    # mirrors `img = torch.rand((2, 2048, 1, 1))` inside forward (NCHW layout)
    img = jax.random.uniform(k_img, (B, CV, 1, 1), jnp.float32)

    out = my_model_forward(prep, ques_tokens, q_len, img)
    out = jax.block_until_ready(out)

    ref = reference_forward(params, ques_tokens, q_len, img)
    assert out.shape == (B, A) and out.dtype == jnp.float32
    assert bool(jnp.all(jnp.isfinite(out)))
    assert bool(jnp.allclose(out, ref, atol=2e-2, rtol=2e-2)), "mismatch vs reference"
    print("KERNEL_OK")
</pallas_src>

<mosaic_0001>
module attributes {stable_mosaic.version = 11 : i64} {
  func.func @fused_vqa_kernel(%arg0: memref<2x8xi32, #tpu.memory_space<smem>>, %arg1: memref<2x1xi32, #tpu.memory_space<vmem>>, %arg2: memref<2x256xf32, #tpu.memory_space<vmem>>, %arg3: memref<200x1x64xf32, #tpu.memory_space<vmem>>, %arg4: memref<64x512xf32, #tpu.memory_space<vmem>>, %arg5: memref<128x512xf32, #tpu.memory_space<vmem>>, %arg6: memref<384x128xf32, #tpu.memory_space<any>>, %arg7: memref<1x128xf32, #tpu.memory_space<vmem>>, %arg8: memref<128x256xf32, #tpu.memory_space<any>>, %arg9: memref<1x256xf32, #tpu.memory_space<vmem>>, %arg10: memref<2x256xf32, #tpu.memory_space<vmem>>, %arg11: memref<16x64xf32, #tpu.memory_space<vmem>>, %arg12: memref<384x128xf32, #tpu.memory_space<vmem>>, %arg13: memref<128x256xf32, #tpu.memory_space<vmem>>, %arg14: memref<2x!tpu.dma_semaphore, #tpu.memory_space<semaphore_mem>>) attributes {dimension_semantics = [], scalar_prefetch = 0 : i64, scratch_operands = 4 : i64, tpu.core_type = #tpu.core_type<tc>} {
    %c0_i32 = arith.constant 0 : i32
    %0 = tpu.memref_slice %arg14[%c0_i32] : memref<2x!tpu.dma_semaphore, #tpu.memory_space<semaphore_mem>> -> memref<1x!tpu.dma_semaphore, #tpu.memory_space<semaphore_mem>>
    %1 = tpu.memref_squeeze %0 : memref<1x!tpu.dma_semaphore, #tpu.memory_space<semaphore_mem>> -> memref<!tpu.dma_semaphore, #tpu.memory_space<semaphore_mem>>
    tpu.enqueue_dma source(%arg6 : memref<384x128xf32, #tpu.memory_space<any>>) target(%arg12 : memref<384x128xf32, #tpu.memory_space<vmem>>) target_semaphore(%1 : memref<!tpu.dma_semaphore, #tpu.memory_space<semaphore_mem>>)
    %c1_i32 = arith.constant 1 : i32
    %2 = tpu.memref_slice %arg14[%c1_i32] : memref<2x!tpu.dma_semaphore, #tpu.memory_space<semaphore_mem>> -> memref<1x!tpu.dma_semaphore, #tpu.memory_space<semaphore_mem>>
    %3 = tpu.memref_squeeze %2 : memref<1x!tpu.dma_semaphore, #tpu.memory_space<semaphore_mem>> -> memref<!tpu.dma_semaphore, #tpu.memory_space<semaphore_mem>>
    tpu.enqueue_dma source(%arg8 : memref<128x256xf32, #tpu.memory_space<any>>) target(%arg13 : memref<128x256xf32, #tpu.memory_space<vmem>>) target_semaphore(%3 : memref<!tpu.dma_semaphore, #tpu.memory_space<semaphore_mem>>)
    %c0 = arith.constant 0 : index
    %c0_0 = arith.constant 0 : index
    %4 = memref.load %arg0[%c0, %c0_0] : memref<2x8xi32, #tpu.memory_space<smem>>
    %5 = arith.index_cast %4 : i32 to index
    %c0_1 = arith.constant 0 : index
    %c0_2 = arith.constant 0 : index
    %6 = vector.load %arg3[%5, %c0_1, %c0_2] : memref<200x1x64xf32, #tpu.memory_space<vmem>>, vector<1x1x64xf32>
    %7 = vector.shape_cast %6 : vector<1x1x64xf32> to vector<1x64xf32>
    %c0_3 = arith.constant 0 : index
    %c0_4 = arith.constant 0 : index
    %8 = vector.load %arg11[%c0_3, %c0_4] : memref<16x64xf32, #tpu.memory_space<vmem>>, vector<1x64xf32>
    tpu.vector_store %arg11[%c0_3, %c0_4], %7 {strides = array<i32>} : memref<16x64xf32, #tpu.memory_space<vmem>>, vector<1x64xf32>,
    %c1 = arith.constant 1 : index
    %c0_5 = arith.constant 0 : index
    %9 = memref.load %arg0[%c1, %c0_5] : memref<2x8xi32, #tpu.memory_space<smem>>
    %10 = arith.index_cast %9 : i32 to index
    %c0_6 = arith.constant 0 : index
    %c0_7 = arith.constant 0 : index
    %11 = vector.load %arg3[%10, %c0_6, %c0_7] : memref<200x1x64xf32, #tpu.memory_space<vmem>>, vector<1x1x64xf32>
    %12 = vector.shape_cast %11 : vector<1x1x64xf32> to vector<1x64xf32>
    %c1_8 = arith.constant 1 : index
    %c0_9 = arith.constant 0 : index
    %13 = vector.load %arg11[%c1_8, %c0_9] : memref<16x64xf32, #tpu.memory_space<vmem>>, vector<1x64xf32>
    tpu.vector_store %arg11[%c1_8, %c0_9], %12 {strides = array<i32>} : memref<16x64xf32, #tpu.memory_space<vmem>>, vector<1x64xf32>,
    %c0_10 = arith.constant 0 : index
    %c1_11 = arith.constant 1 : index
    %14 = memref.load %arg0[%c0_10, %c1_11] : memref<2x8xi32, #tpu.memory_space<smem>>
    %15 = arith.index_cast %14 : i32 to index
    %c0_12 = arith.constant 0 : index
    %c0_13 = arith.constant 0 : index
    %16 = vector.load %arg3[%15, %c0_12, %c0_13] : memref<200x1x64xf32, #tpu.memory_space<vmem>>, vector<1x1x64xf32>
    %17 = vector.shape_cast %16 : vector<1x1x64xf32> to vector<1x64xf32>
    %c2 = arith.constant 2 : index
    %c0_14 = arith.constant 0 : index
    %18 = vector.load %arg11[%c2, %c0_14] : memref<16x64xf32, #tpu.memory_space<vmem>>, vector<1x64xf32>
    tpu.vector_store %arg11[%c2, %c0_14], %17 {strides = array<i32>} : memref<16x64xf32, #tpu.memory_space<vmem>>, vector<1x64xf32>,
    %c1_15 = arith.constant 1 : index
    %c1_16 = arith.constant 1 : index
    %19 = memref.load %arg0[%c1_15, %c1_16] : memref<2x8xi32, #tpu.memory_space<smem>>
    %20 = arith.index_cast %19 : i32 to index
    %c0_17 = arith.constant 0 : index
    %c0_18 = arith.constant 0 : index
    %21 = vector.load %arg3[%20, %c0_17, %c0_18] : memref<200x1x64xf32, #tpu.memory_space<vmem>>, vector<1x1x64xf32>
    %22 = vector.shape_cast %21 : vector<1x1x64xf32> to vector<1x64xf32>
    %c3 = arith.constant 3 : index
    %c0_19 = arith.constant 0 : index
    %23 = vector.load %arg11[%c3, %c0_19] : memref<16x64xf32, #tpu.memory_space<vmem>>, vector<1x64xf32>
    tpu.vector_store %arg11[%c3, %c0_19], %22 {strides = array<i32>} : memref<16x64xf32, #tpu.memory_space<vmem>>, vector<1x64xf32>,
    %c0_20 = arith.constant 0 : index
    %c2_21 = arith.constant 2 : index
    %24 = memref.load %arg0[%c0_20, %c2_21] : memref<2x8xi32, #tpu.memory_space<smem>>
    %25 = arith.index_cast %24 : i32 to index
    %c0_22 = arith.constant 0 : index
    %c0_23 = arith.constant 0 : index
    %26 = vector.load %arg3[%25, %c0_22, %c0_23] : memref<200x1x64xf32, #tpu.memory_space<vmem>>, vector<1x1x64xf32>
    %27 = vector.shape_cast %26 : vector<1x1x64xf32> to vector<1x64xf32>
    %c4 = arith.constant 4 : index
    %c0_24 = arith.constant 0 : index
    %28 = vector.load %arg11[%c4, %c0_24] : memref<16x64xf32, #tpu.memory_space<vmem>>, vector<1x64xf32>
    tpu.vector_store %arg11[%c4, %c0_24], %27 {strides = array<i32>} : memref<16x64xf32, #tpu.memory_space<vmem>>, vector<1x64xf32>,
    %c1_25 = arith.constant 1 : index
    %c2_26 = arith.constant 2 : index
    %29 = memref.load %arg0[%c1_25, %c2_26] : memref<2x8xi32, #tpu.memory_space<smem>>
    %30 = arith.index_cast %29 : i32 to index
    %c0_27 = arith.constant 0 : index
    %c0_28 = arith.constant 0 : index
    %31 = vector.load %arg3[%30, %c0_27, %c0_28] : memref<200x1x64xf32, #tpu.memory_space<vmem>>, vector<1x1x64xf32>
    %32 = vector.shape_cast %31 : vector<1x1x64xf32> to vector<1x64xf32>
    %c5 = arith.constant 5 : index
    %c0_29 = arith.constant 0 : index
    %33 = vector.load %arg11[%c5, %c0_29] : memref<16x64xf32, #tpu.memory_space<vmem>>, vector<1x64xf32>
    tpu.vector_store %arg11[%c5, %c0_29], %32 {strides = array<i32>} : memref<16x64xf32, #tpu.memory_space<vmem>>, vector<1x64xf32>,
    %c0_30 = arith.constant 0 : index
    %c3_31 = arith.constant 3 : index
    %34 = memref.load %arg0[%c0_30, %c3_31] : memref<2x8xi32, #tpu.memory_space<smem>>
    %35 = arith.index_cast %34 : i32 to index
    %c0_32 = arith.constant 0 : index
    %c0_33 = arith.constant 0 : index
    %36 = vector.load %arg3[%35, %c0_32, %c0_33] : memref<200x1x64xf32, #tpu.memory_space<vmem>>, vector<1x1x64xf32>
    %37 = vector.shape_cast %36 : vector<1x1x64xf32> to vector<1x64xf32>
    %c6 = arith.constant 6 : index
    %c0_34 = arith.constant 0 : index
    %38 = vector.load %arg11[%c6, %c0_34] : memref<16x64xf32, #tpu.memory_space<vmem>>, vector<1x64xf32>
    tpu.vector_store %arg11[%c6, %c0_34], %37 {strides = array<i32>} : memref<16x64xf32, #tpu.memory_space<vmem>>, vector<1x64xf32>,
    %c1_35 = arith.constant 1 : index
    %c3_36 = arith.constant 3 : index
    %39 = memref.load %arg0[%c1_35, %c3_36] : memref<2x8xi32, #tpu.memory_space<smem>>
    %40 = arith.index_cast %39 : i32 to index
    %c0_37 = arith.constant 0 : index
    %c0_38 = arith.constant 0 : index
    %41 = vector.load %arg3[%40, %c0_37, %c0_38] : memref<200x1x64xf32, #tpu.memory_space<vmem>>, vector<1x1x64xf32>
    %42 = vector.shape_cast %41 : vector<1x1x64xf32> to vector<1x64xf32>
    %c7 = arith.constant 7 : index
    %c0_39 = arith.constant 0 : index
    %43 = vector.load %arg11[%c7, %c0_39] : memref<16x64xf32, #tpu.memory_space<vmem>>, vector<1x64xf32>
    tpu.vector_store %arg11[%c7, %c0_39], %42 {strides = array<i32>} : memref<16x64xf32, #tpu.memory_space<vmem>>, vector<1x64xf32>,
    %c0_40 = arith.constant 0 : index
    %c4_41 = arith.constant 4 : index
    %44 = memref.load %arg0[%c0_40, %c4_41] : memref<2x8xi32, #tpu.memory_space<smem>>
    %45 = arith.index_cast %44 : i32 to index
    %c0_42 = arith.constant 0 : index
    %c0_43 = arith.constant 0 : index
    %46 = vector.load %arg3[%45, %c0_42, %c0_43] : memref<200x1x64xf32, #tpu.memory_space<vmem>>, vector<1x1x64xf32>
    %47 = vector.shape_cast %46 : vector<1x1x64xf32> to vector<1x64xf32>
    %c8 = arith.constant 8 : index
    %c0_44 = arith.constant 0 : index
    %48 = vector.load %arg11[%c8, %c0_44] : memref<16x64xf32, #tpu.memory_space<vmem>>, vector<1x64xf32>
    tpu.vector_store %arg11[%c8, %c0_44], %47 {strides = array<i32>} : memref<16x64xf32, #tpu.memory_space<vmem>>, vector<1x64xf32>,
    %c1_45 = arith.constant 1 : index
    %c4_46 = arith.constant 4 : index
    %49 = memref.load %arg0[%c1_45, %c4_46] : memref<2x8xi32, #tpu.memory_space<smem>>
    %50 = arith.index_cast %49 : i32 to index
    %c0_47 = arith.constant 0 : index
    %c0_48 = arith.constant 0 : index
    %51 = vector.load %arg3[%50, %c0_47, %c0_48] : memref<200x1x64xf32, #tpu.memory_space<vmem>>, vector<1x1x64xf32>
    %52 = vector.shape_cast %51 : vector<1x1x64xf32> to vector<1x64xf32>
    %c9 = arith.constant 9 : index
    %c0_49 = arith.constant 0 : index
    %53 = vector.load %arg11[%c9, %c0_49] : memref<16x64xf32, #tpu.memory_space<vmem>>, vector<1x64xf32>
    tpu.vector_store %arg11[%c9, %c0_49], %52 {strides = array<i32>} : memref<16x64xf32, #tpu.memory_space<vmem>>, vector<1x64xf32>,
    %c0_50 = arith.constant 0 : index
    %c5_51 = arith.constant 5 : index
    %54 = memref.load %arg0[%c0_50, %c5_51] : memref<2x8xi32, #tpu.memory_space<smem>>
    %55 = arith.index_cast %54 : i32 to index
    %c0_52 = arith.constant 0 : index
    %c0_53 = arith.constant 0 : index
    %56 = vector.load %arg3[%55, %c0_52, %c0_53] : memref<200x1x64xf32, #tpu.memory_space<vmem>>, vector<1x1x64xf32>
    %57 = vector.shape_cast %56 : vector<1x1x64xf32> to vector<1x64xf32>
    %c10 = arith.constant 10 : index
    %c0_54 = arith.constant 0 : index
    %58 = vector.load %arg11[%c10, %c0_54] : memref<16x64xf32, #tpu.memory_space<vmem>>, vector<1x64xf32>
    tpu.vector_store %arg11[%c10, %c0_54], %57 {strides = array<i32>} : memref<16x64xf32, #tpu.memory_space<vmem>>, vector<1x64xf32>,
    %c1_55 = arith.constant 1 : index
    %c5_56 = arith.constant 5 : index
    %59 = memref.load %arg0[%c1_55, %c5_56] : memref<2x8xi32, #tpu.memory_space<smem>>
    %60 = arith.index_cast %59 : i32 to index
    %c0_57 = arith.constant 0 : index
    %c0_58 = arith.constant 0 : index
    %61 = vector.load %arg3[%60, %c0_57, %c0_58] : memref<200x1x64xf32, #tpu.memory_space<vmem>>, vector<1x1x64xf32>
    %62 = vector.shape_cast %61 : vector<1x1x64xf32> to vector<1x64xf32>
    %c11 = arith.constant 11 : index
    %c0_59 = arith.constant 0 : index
    %63 = vector.load %arg11[%c11, %c0_59] : memref<16x64xf32, #tpu.memory_space<vmem>>, vector<1x64xf32>
    tpu.vector_store %arg11[%c11, %c0_59], %62 {strides = array<i32>} : memref<16x64xf32, #tpu.memory_space<vmem>>, vector<1x64xf32>,
    %c0_60 = arith.constant 0 : index
    %c6_61 = arith.constant 6 : index
    %64 = memref.load %arg0[%c0_60, %c6_61] : memref<2x8xi32, #tpu.memory_space<smem>>
    %65 = arith.index_cast %64 : i32 to index
    %c0_62 = arith.constant 0 : index
    %c0_63 = arith.constant 0 : index
    %66 = vector.load %arg3[%65, %c0_62, %c0_63] : memref<200x1x64xf32, #tpu.memory_space<vmem>>, vector<1x1x64xf32>
    %67 = vector.shape_cast %66 : vector<1x1x64xf32> to vector<1x64xf32>
    %c12 = arith.constant 12 : index
    %c0_64 = arith.constant 0 : index
    %68 = vector.load %arg11[%c12, %c0_64] : memref<16x64xf32, #tpu.memory_space<vmem>>, vector<1x64xf32>
    tpu.vector_store %arg11[%c12, %c0_64], %67 {strides = array<i32>} : memref<16x64xf32, #tpu.memory_space<vmem>>, vector<1x64xf32>,
    %c1_65 = arith.constant 1 : index
    %c6_66 = arith.constant 6 : index
    %69 = memref.load %arg0[%c1_65, %c6_66] : memref<2x8xi32, #tpu.memory_space<smem>>
    %70 = arith.index_cast %69 : i32 to index
    %c0_67 = arith.constant 0 : index
    %c0_68 = arith.constant 0 : index
    %71 = vector.load %arg3[%70, %c0_67, %c0_68] : memref<200x1x64xf32, #tpu.memory_space<vmem>>, vector<1x1x64xf32>
    %72 = vector.shape_cast %71 : vector<1x1x64xf32> to vector<1x64xf32>
    %c13 = arith.constant 13 : index
    %c0_69 = arith.constant 0 : index
    %73 = vector.load %arg11[%c13, %c0_69] : memref<16x64xf32, #tpu.memory_space<vmem>>, vector<1x64xf32>
    tpu.vector_store %arg11[%c13, %c0_69], %72 {strides = array<i32>} : memref<16x64xf32, #tpu.memory_space<vmem>>, vector<1x64xf32>,
    %c0_70 = arith.constant 0 : index
    %c7_71 = arith.constant 7 : index
    %74 = memref.load %arg0[%c0_70, %c7_71] : memref<2x8xi32, #tpu.memory_space<smem>>
    %75 = arith.index_cast %74 : i32 to index
    %c0_72 = arith.constant 0 : index
    %c0_73 = arith.constant 0 : index
    %76 = vector.load %arg3[%75, %c0_72, %c0_73] : memref<200x1x64xf32, #tpu.memory_space<vmem>>, vector<1x1x64xf32>
    %77 = vector.shape_cast %76 : vector<1x1x64xf32> to vector<1x64xf32>
    %c14 = arith.constant 14 : index
    %c0_74 = arith.constant 0 : index
    %78 = vector.load %arg11[%c14, %c0_74] : memref<16x64xf32, #tpu.memory_space<vmem>>, vector<1x64xf32>
    tpu.vector_store %arg11[%c14, %c0_74], %77 {strides = array<i32>} : memref<16x64xf32, #tpu.memory_space<vmem>>, vector<1x64xf32>,
    %c1_75 = arith.constant 1 : index
    %c7_76 = arith.constant 7 : index
    %79 = memref.load %arg0[%c1_75, %c7_76] : memref<2x8xi32, #tpu.memory_space<smem>>
    %80 = arith.index_cast %79 : i32 to index
    %c0_77 = arith.constant 0 : index
    %c0_78 = arith.constant 0 : index
    %81 = vector.load %arg3[%80, %c0_77, %c0_78] : memref<200x1x64xf32, #tpu.memory_space<vmem>>, vector<1x1x64xf32>
    %82 = vector.shape_cast %81 : vector<1x1x64xf32> to vector<1x64xf32>
    %c15 = arith.constant 15 : index
    %c0_79 = arith.constant 0 : index
    %83 = vector.load %arg11[%c15, %c0_79] : memref<16x64xf32, #tpu.memory_space<vmem>>, vector<1x64xf32>
    tpu.vector_store %arg11[%c15, %c0_79], %82 {strides = array<i32>} : memref<16x64xf32, #tpu.memory_space<vmem>>, vector<1x64xf32>,
    %c0_80 = arith.constant 0 : index
    %c0_81 = arith.constant 0 : index
    %84 = vector.load %arg11[%c0_80, %c0_81] : memref<16x64xf32, #tpu.memory_space<vmem>>, vector<16x64xf32>
    %85 = math.tanh %84 : vector<16x64xf32>
    %c0_82 = arith.constant 0 : index
    %c0_83 = arith.constant 0 : index
    %86 = vector.load %arg4[%c0_82, %c0_83] : memref<64x512xf32, #tpu.memory_space<vmem>>, vector<64x512xf32>
    %cst = arith.constant dense<0.000000e+00> : vector<16x512xf32>
    %87 = tpu.matmul %85, %86, %cst {dimension_numbers = #tpu.dot_dimension_numbers<[1], [0], [0], [1], [0, 0, 1, 1], [], []>} : vector<16x64xf32>, vector<64x512xf32>, vector<16x512xf32> -> vector<16x512xf32>
    %c0_84 = arith.constant 0 : index
    %c0_85 = arith.constant 0 : index
    %88 = vector.load %arg5[%c0_84, %c0_85] : memref<128x512xf32, #tpu.memory_space<vmem>>, vector<128x512xf32>
    %c0_86 = arith.constant 0 : index
    %c0_87 = arith.constant 0 : index
    %89 = vector.load %arg1[%c0_86, %c0_87] : memref<2x1xi32, #tpu.memory_space<vmem>>, vector<2x1xi32>
    %90 = vector.shape_cast %89 : vector<2x1xi32> to vector<2x1xi32>
    %91 = vector.broadcast %90 : vector<2x1xi32> to vector<2x128xi32>
    %cst_88 = arith.constant 0.000000e+00 : f32
    %92 = vector.broadcast %cst_88 : f32 to vector<2x128xf32>
    %cst_89 = arith.constant 0.000000e+00 : f32
    %93 = vector.broadcast %cst_89 : f32 to vector<2x128xf32>
    %94 = vector.extract_strided_slice %87 {offsets = [0, 0], sizes = [2, 512], strides = [1, 1]} : vector<16x512xf32> to vector<2x512xf32>
    %cst_90 = arith.constant dense<0.000000e+00> : vector<2x512xf32>
    %95 = tpu.matmul %92, %88, %cst_90 {dimension_numbers = #tpu.dot_dimension_numbers<[1], [0], [0], [1], [0, 0, 1, 1], [], []>} : vector<2x128xf32>, vector<128x512xf32>, vector<2x512xf32> -> vector<2x512xf32>
    %96 = arith.addf %94, %95 : vector<2x512xf32>
    %97 = math.tanh %96 : vector<2x512xf32>
    %98 = vector.extract_strided_slice %97 {offsets = [0, 0], sizes = [2, 128], strides = [1, 1]} : vector<2x512xf32> to vector<2x128xf32>
    %cst_91 = arith.constant 5.000000e-01 : f32
    %99 = vector.broadcast %cst_91 : f32 to vector<2x128xf32>
    %100 = arith.mulf %99, %98 : vector<2x128xf32>
    %cst_92 = arith.constant 5.000000e-01 : f32
    %101 = vector.broadcast %cst_92 : f32 to vector<2x128xf32>
    %102 = arith.addf %100, %101 : vector<2x128xf32>
    %103 = vector.extract_strided_slice %97 {offsets = [0, 128], sizes = [2, 128], strides = [1, 1]} : vector<2x512xf32> to vector<2x128xf32>
    %cst_93 = arith.constant 5.000000e-01 : f32
    %104 = vector.broadcast %cst_93 : f32 to vector<2x128xf32>
    %105 = arith.mulf %104, %103 : vector<2x128xf32>
    %cst_94 = arith.constant 5.000000e-01 : f32
    %106 = vector.broadcast %cst_94 : f32 to vector<2x128xf32>
    %107 = arith.addf %105, %106 : vector<2x128xf32>
    %108 = vector.extract_strided_slice %97 {offsets = [0, 256], sizes = [2, 128], strides = [1, 1]} : vector<2x512xf32> to vector<2x128xf32>
    %109 = vector.extract_strided_slice %97 {offsets = [0, 384], sizes = [2, 128], strides = [1, 1]} : vector<2x512xf32> to vector<2x128xf32>
    %cst_95 = arith.constant 5.000000e-01 : f32
    %110 = vector.broadcast %cst_95 : f32 to vector<2x128xf32>
    %111 = arith.mulf %110, %109 : vector<2x128xf32>
    %cst_96 = arith.constant 5.000000e-01 : f32
    %112 = vector.broadcast %cst_96 : f32 to vector<2x128xf32>
    %113 = arith.addf %111, %112 : vector<2x128xf32>
    %114 = arith.mulf %107, %93 : vector<2x128xf32>
    %115 = arith.mulf %102, %108 : vector<2x128xf32>
    %116 = arith.addf %114, %115 : vector<2x128xf32>
    %117 = math.tanh %116 : vector<2x128xf32>
    %118 = arith.mulf %113, %117 : vector<2x128xf32>
    %c0_i32_97 = arith.constant 0 : i32
    %119 = vector.broadcast %c0_i32_97 : i32 to vector<2x128xi32>
    %120 = arith.cmpi sgt, %91, %119 : vector<2x128xi32>
    %121 = arith.select %120, %118, %92 : vector<2x128xi1>, vector<2x128xf32>
    %122 = arith.select %120, %116, %93 : vector<2x128xi1>, vector<2x128xf32>
    %123 = vector.extract_strided_slice %87 {offsets = [2, 0], sizes = [2, 512], strides = [1, 1]} : vector<16x512xf32> to vector<2x512xf32>
    %cst_98 = arith.constant dense<0.000000e+00> : vector<2x512xf32>
    %124 = tpu.matmul %121, %88, %cst_98 {dimension_numbers = #tpu.dot_dimension_numbers<[1], [0], [0], [1], [0, 0, 1, 1], [], []>} : vector<2x128xf32>, vector<128x512xf32>, vector<2x512xf32> -> vector<2x512xf32>
    %125 = arith.addf %123, %124 : vector<2x512xf32>
    %126 = math.tanh %125 : vector<2x512xf32>
    %127 = vector.extract_strided_slice %126 {offsets = [0, 0], sizes = [2, 128], strides = [1, 1]} : vector<2x512xf32> to vector<2x128xf32>
    %cst_99 = arith.constant 5.000000e-01 : f32
    %128 = vector.broadcast %cst_99 : f32 to vector<2x128xf32>
    %129 = arith.mulf %128, %127 : vector<2x128xf32>
    %cst_100 = arith.constant 5.000000e-01 : f32
    %130 = vector.broadcast %cst_100 : f32 to vector<2x128xf32>
    %131 = arith.addf %129, %130 : vector<2x128xf32>
    %132 = vector.extract_strided_slice %126 {offsets = [0, 128], sizes = [2, 128], strides = [1, 1]} : vector<2x512xf32> to vector<2x128xf32>
    %cst_101 = arith.constant 5.000000e-01 : f32
    %133 = vector.broadcast %cst_101 : f32 to vector<2x128xf32>
    %134 = arith.mulf %133, %132 : vector<2x128xf32>
    %cst_102 = arith.constant 5.000000e-01 : f32
    %135 = vector.broadcast %cst_102 : f32 to vector<2x128xf32>
    %136 = arith.addf %134, %135 : vector<2x128xf32>
    %137 = vector.extract_strided_slice %126 {offsets = [0, 256], sizes = [2, 128], strides = [1, 1]} : vector<2x512xf32> to vector<2x128xf32>
    %138 = vector.extract_strided_slice %126 {offsets = [0, 384], sizes = [2, 128], strides = [1, 1]} : vector<2x512xf32> to vector<2x128xf32>
    %cst_103 = arith.constant 5.000000e-01 : f32
    %139 = vector.broadcast %cst_103 : f32 to vector<2x128xf32>
    %140 = arith.mulf %139, %138 : vector<2x128xf32>
    %cst_104 = arith.constant 5.000000e-01 : f32
    %141 = vector.broadcast %cst_104 : f32 to vector<2x128xf32>
    %142 = arith.addf %140, %141 : vector<2x128xf32>
    %143 = arith.mulf %136, %122 : vector<2x128xf32>
    %144 = arith.mulf %131, %137 : vector<2x128xf32>
    %145 = arith.addf %143, %144 : vector<2x128xf32>
    %146 = math.tanh %145 : vector<2x128xf32>
    %147 = arith.mulf %142, %146 : vector<2x128xf32>
    %c1_i32_105 = arith.constant 1 : i32
    %148 = vector.broadcast %c1_i32_105 : i32 to vector<2x128xi32>
    %149 = arith.cmpi sgt, %91, %148 : vector<2x128xi32>
    %150 = arith.select %149, %147, %121 : vector<2x128xi1>, vector<2x128xf32>
    %151 = arith.select %149, %145, %122 : vector<2x128xi1>, vector<2x128xf32>
    %152 = vector.extract_strided_slice %87 {offsets = [4, 0], sizes = [2, 512], strides = [1, 1]} : vector<16x512xf32> to vector<2x512xf32>
    %cst_106 = arith.constant dense<0.000000e+00> : vector<2x512xf32>
    %153 = tpu.matmul %150, %88, %cst_106 {dimension_numbers = #tpu.dot_dimension_numbers<[1], [0], [0], [1], [0, 0, 1, 1], [], []>} : vector<2x128xf32>, vector<128x512xf32>, vector<2x512xf32> -> vector<2x512xf32>
    %154 = arith.addf %152, %153 : vector<2x512xf32>
    %155 = math.tanh %154 : vector<2x512xf32>
    %156 = vector.extract_strided_slice %155 {offsets = [0, 0], sizes = [2, 128], strides = [1, 1]} : vector<2x512xf32> to vector<2x128xf32>
    %cst_107 = arith.constant 5.000000e-01 : f32
    %157 = vector.broadcast %cst_107 : f32 to vector<2x128xf32>
    %158 = arith.mulf %157, %156 : vector<2x128xf32>
    %cst_108 = arith.constant 5.000000e-01 : f32
    %159 = vector.broadcast %cst_108 : f32 to vector<2x128xf32>
    %160 = arith.addf %158, %159 : vector<2x128xf32>
    %161 = vector.extract_strided_slice %155 {offsets = [0, 128], sizes = [2, 128], strides = [1, 1]} : vector<2x512xf32> to vector<2x128xf32>
    %cst_109 = arith.constant 5.000000e-01 : f32
    %162 = vector.broadcast %cst_109 : f32 to vector<2x128xf32>
    %163 = arith.mulf %162, %161 : vector<2x128xf32>
    %cst_110 = arith.constant 5.000000e-01 : f32
    %164 = vector.broadcast %cst_110 : f32 to vector<2x128xf32>
    %165 = arith.addf %163, %164 : vector<2x128xf32>
    %166 = vector.extract_strided_slice %155 {offsets = [0, 256], sizes = [2, 128], strides = [1, 1]} : vector<2x512xf32> to vector<2x128xf32>
    %167 = vector.extract_strided_slice %155 {offsets = [0, 384], sizes = [2, 128], strides = [1, 1]} : vector<2x512xf32> to vector<2x128xf32>
    %cst_111 = arith.constant 5.000000e-01 : f32
    %168 = vector.broadcast %cst_111 : f32 to vector<2x128xf32>
    %169 = arith.mulf %168, %167 : vector<2x128xf32>
    %cst_112 = arith.constant 5.000000e-01 : f32
    %170 = vector.broadcast %cst_112 : f32 to vector<2x128xf32>
    %171 = arith.addf %169, %170 : vector<2x128xf32>
    %172 = arith.mulf %165, %151 : vector<2x128xf32>
    %173 = arith.mulf %160, %166 : vector<2x128xf32>
    %174 = arith.addf %172, %173 : vector<2x128xf32>
    %175 = math.tanh %174 : vector<2x128xf32>
    %176 = arith.mulf %171, %175 : vector<2x128xf32>
    %c2_i32 = arith.constant 2 : i32
    %177 = vector.broadcast %c2_i32 : i32 to vector<2x128xi32>
    %178 = arith.cmpi sgt, %91, %177 : vector<2x128xi32>
    %179 = arith.select %178, %176, %150 : vector<2x128xi1>, vector<2x128xf32>
    %180 = arith.select %178, %174, %151 : vector<2x128xi1>, vector<2x128xf32>
    %181 = vector.extract_strided_slice %87 {offsets = [6, 0], sizes = [2, 512], strides = [1, 1]} : vector<16x512xf32> to vector<2x512xf32>
    %cst_113 = arith.constant dense<0.000000e+00> : vector<2x512xf32>
    %182 = tpu.matmul %179, %88, %cst_113 {dimension_numbers = #tpu.dot_dimension_numbers<[1], [0], [0], [1], [0, 0, 1, 1], [], []>} : vector<2x128xf32>, vector<128x512xf32>, vector<2x512xf32> -> vector<2x512xf32>
    %183 = arith.addf %181, %182 : vector<2x512xf32>
    %184 = math.tanh %183 : vector<2x512xf32>
    %185 = vector.extract_strided_slice %184 {offsets = [0, 0], sizes = [2, 128], strides = [1, 1]} : vector<2x512xf32> to vector<2x128xf32>
    %cst_114 = arith.constant 5.000000e-01 : f32
    %186 = vector.broadcast %cst_114 : f32 to vector<2x128xf32>
    %187 = arith.mulf %186, %185 : vector<2x128xf32>
    %cst_115 = arith.constant 5.000000e-01 : f32
    %188 = vector.broadcast %cst_115 : f32 to vector<2x128xf32>
    %189 = arith.addf %187, %188 : vector<2x128xf32>
    %190 = vector.extract_strided_slice %184 {offsets = [0, 128], sizes = [2, 128], strides = [1, 1]} : vector<2x512xf32> to vector<2x128xf32>
    %cst_116 = arith.constant 5.000000e-01 : f32
    %191 = vector.broadcast %cst_116 : f32 to vector<2x128xf32>
    %192 = arith.mulf %191, %190 : vector<2x128xf32>
    %cst_117 = arith.constant 5.000000e-01 : f32
    %193 = vector.broadcast %cst_117 : f32 to vector<2x128xf32>
    %194 = arith.addf %192, %193 : vector<2x128xf32>
    %195 = vector.extract_strided_slice %184 {offsets = [0, 256], sizes = [2, 128], strides = [1, 1]} : vector<2x512xf32> to vector<2x128xf32>
    %196 = vector.extract_strided_slice %184 {offsets = [0, 384], sizes = [2, 128], strides = [1, 1]} : vector<2x512xf32> to vector<2x128xf32>
    %cst_118 = arith.constant 5.000000e-01 : f32
    %197 = vector.broadcast %cst_118 : f32 to vector<2x128xf32>
    %198 = arith.mulf %197, %196 : vector<2x128xf32>
    %cst_119 = arith.constant 5.000000e-01 : f32
    %199 = vector.broadcast %cst_119 : f32 to vector<2x128xf32>
    %200 = arith.addf %198, %199 : vector<2x128xf32>
    %201 = arith.mulf %194, %180 : vector<2x128xf32>
    %202 = arith.mulf %189, %195 : vector<2x128xf32>
    %203 = arith.addf %201, %202 : vector<2x128xf32>
    %204 = math.tanh %203 : vector<2x128xf32>
    %205 = arith.mulf %200, %204 : vector<2x128xf32>
    %c3_i32 = arith.constant 3 : i32
    %206 = vector.broadcast %c3_i32 : i32 to vector<2x128xi32>
    %207 = arith.cmpi sgt, %91, %206 : vector<2x128xi32>
    %208 = arith.select %207, %205, %179 : vector<2x128xi1>, vector<2x128xf32>
    %209 = arith.select %207, %203, %180 : vector<2x128xi1>, vector<2x128xf32>
    %210 = vector.extract_strided_slice %87 {offsets = [8, 0], sizes = [2, 512], strides = [1, 1]} : vector<16x512xf32> to vector<2x512xf32>
    %cst_120 = arith.constant dense<0.000000e+00> : vector<2x512xf32>
    %211 = tpu.matmul %208, %88, %cst_120 {dimension_numbers = #tpu.dot_dimension_numbers<[1], [0], [0], [1], [0, 0, 1, 1], [], []>} : vector<2x128xf32>, vector<128x512xf32>, vector<2x512xf32> -> vector<2x512xf32>
    %212 = arith.addf %210, %211 : vector<2x512xf32>
    %213 = math.tanh %212 : vector<2x512xf32>
    %214 = vector.extract_strided_slice %213 {offsets = [0, 0], sizes = [2, 128], strides = [1, 1]} : vector<2x512xf32> to vector<2x128xf32>
    %cst_121 = arith.constant 5.000000e-01 : f32
    %215 = vector.broadcast %cst_121 : f32 to vector<2x128xf32>
    %216 = arith.mulf %215, %214 : vector<2x128xf32>
    %cst_122 = arith.constant 5.000000e-01 : f32
    %217 = vector.broadcast %cst_122 : f32 to vector<2x128xf32>
    %218 = arith.addf %216, %217 : vector<2x128xf32>
    %219 = vector.extract_strided_slice %213 {offsets = [0, 128], sizes = [2, 128], strides = [1, 1]} : vector<2x512xf32> to vector<2x128xf32>
    %cst_123 = arith.constant 5.000000e-01 : f32
    %220 = vector.broadcast %cst_123 : f32 to vector<2x128xf32>
    %221 = arith.mulf %220, %219 : vector<2x128xf32>
    %cst_124 = arith.constant 5.000000e-01 : f32
    %222 = vector.broadcast %cst_124 : f32 to vector<2x128xf32>
    %223 = arith.addf %221, %222 : vector<2x128xf32>
    %224 = vector.extract_strided_slice %213 {offsets = [0, 256], sizes = [2, 128], strides = [1, 1]} : vector<2x512xf32> to vector<2x128xf32>
    %225 = vector.extract_strided_slice %213 {offsets = [0, 384], sizes = [2, 128], strides = [1, 1]} : vector<2x512xf32> to vector<2x128xf32>
    %cst_125 = arith.constant 5.000000e-01 : f32
    %226 = vector.broadcast %cst_125 : f32 to vector<2x128xf32>
    %227 = arith.mulf %226, %225 : vector<2x128xf32>
    %cst_126 = arith.constant 5.000000e-01 : f32
    %228 = vector.broadcast %cst_126 : f32 to vector<2x128xf32>
    %229 = arith.addf %227, %228 : vector<2x128xf32>
    %230 = arith.mulf %223, %209 : vector<2x128xf32>
    %231 = arith.mulf %218, %224 : vector<2x128xf32>
    %232 = arith.addf %230, %231 : vector<2x128xf32>
    %233 = math.tanh %232 : vector<2x128xf32>
    %234 = arith.mulf %229, %233 : vector<2x128xf32>
    %c4_i32 = arith.constant 4 : i32
    %235 = vector.broadcast %c4_i32 : i32 to vector<2x128xi32>
    %236 = arith.cmpi sgt, %91, %235 : vector<2x128xi32>
    %237 = arith.select %236, %234, %208 : vector<2x128xi1>, vector<2x128xf32>
    %238 = arith.select %236, %232, %209 : vector<2x128xi1>, vector<2x128xf32>
    %239 = vector.extract_strided_slice %87 {offsets = [10, 0], sizes = [2, 512], strides = [1, 1]} : vector<16x512xf32> to vector<2x512xf32>
    %cst_127 = arith.constant dense<0.000000e+00> : vector<2x512xf32>
    %240 = tpu.matmul %237, %88, %cst_127 {dimension_numbers = #tpu.dot_dimension_numbers<[1], [0], [0], [1], [0, 0, 1, 1], [], []>} : vector<2x128xf32>, vector<128x512xf32>, vector<2x512xf32> -> vector<2x512xf32>
    %241 = arith.addf %239, %240 : vector<2x512xf32>
    %242 = math.tanh %241 : vector<2x512xf32>
    %243 = vector.extract_strided_slice %242 {offsets = [0, 0], sizes = [2, 128], strides = [1, 1]} : vector<2x512xf32> to vector<2x128xf32>
    %cst_128 = arith.constant 5.000000e-01 : f32
    %244 = vector.broadcast %cst_128 : f32 to vector<2x128xf32>
    %245 = arith.mulf %244, %243 : vector<2x128xf32>
    %cst_129 = arith.constant 5.000000e-01 : f32
    %246 = vector.broadcast %cst_129 : f32 to vector<2x128xf32>
    %247 = arith.addf %245, %246 : vector<2x128xf32>
    %248 = vector.extract_strided_slice %242 {offsets = [0, 128], sizes = [2, 128], strides = [1, 1]} : vector<2x512xf32> to vector<2x128xf32>
    %cst_130 = arith.constant 5.000000e-01 : f32
    %249 = vector.broadcast %cst_130 : f32 to vector<2x128xf32>
    %250 = arith.mulf %249, %248 : vector<2x128xf32>
    %cst_131 = arith.constant 5.000000e-01 : f32
    %251 = vector.broadcast %cst_131 : f32 to vector<2x128xf32>
    %252 = arith.addf %250, %251 : vector<2x128xf32>
    %253 = vector.extract_strided_slice %242 {offsets = [0, 256], sizes = [2, 128], strides = [1, 1]} : vector<2x512xf32> to vector<2x128xf32>
    %254 = vector.extract_strided_slice %242 {offsets = [0, 384], sizes = [2, 128], strides = [1, 1]} : vector<2x512xf32> to vector<2x128xf32>
    %cst_132 = arith.constant 5.000000e-01 : f32
    %255 = vector.broadcast %cst_132 : f32 to vector<2x128xf32>
    %256 = arith.mulf %255, %254 : vector<2x128xf32>
    %cst_133 = arith.constant 5.000000e-01 : f32
    %257 = vector.broadcast %cst_133 : f32 to vector<2x128xf32>
    %258 = arith.addf %256, %257 : vector<2x128xf32>
    %259 = arith.mulf %252, %238 : vector<2x128xf32>
    %260 = arith.mulf %247, %253 : vector<2x128xf32>
    %261 = arith.addf %259, %260 : vector<2x128xf32>
    %262 = math.tanh %261 : vector<2x128xf32>
    %263 = arith.mulf %258, %262 : vector<2x128xf32>
    %c5_i32 = arith.constant 5 : i32
    %264 = vector.broadcast %c5_i32 : i32 to vector<2x128xi32>
    %265 = arith.cmpi sgt, %91, %264 : vector<2x128xi32>
    %266 = arith.select %265, %263, %237 : vector<2x128xi1>, vector<2x128xf32>
    %267 = arith.select %265, %261, %238 : vector<2x128xi1>, vector<2x128xf32>
    %268 = vector.extract_strided_slice %87 {offsets = [12, 0], sizes = [2, 512], strides = [1, 1]} : vector<16x512xf32> to vector<2x512xf32>
    %cst_134 = arith.constant dense<0.000000e+00> : vector<2x512xf32>
    %269 = tpu.matmul %266, %88, %cst_134 {dimension_numbers = #tpu.dot_dimension_numbers<[1], [0], [0], [1], [0, 0, 1, 1], [], []>} : vector<2x128xf32>, vector<128x512xf32>, vector<2x512xf32> -> vector<2x512xf32>
    %270 = arith.addf %268, %269 : vector<2x512xf32>
    %271 = math.tanh %270 : vector<2x512xf32>
    %272 = vector.extract_strided_slice %271 {offsets = [0, 0], sizes = [2, 128], strides = [1, 1]} : vector<2x512xf32> to vector<2x128xf32>
    %cst_135 = arith.constant 5.000000e-01 : f32
    %273 = vector.broadcast %cst_135 : f32 to vector<2x128xf32>
    %274 = arith.mulf %273, %272 : vector<2x128xf32>
    %cst_136 = arith.constant 5.000000e-01 : f32
    %275 = vector.broadcast %cst_136 : f32 to vector<2x128xf32>
    %276 = arith.addf %274, %275 : vector<2x128xf32>
    %277 = vector.extract_strided_slice %271 {offsets = [0, 128], sizes = [2, 128], strides = [1, 1]} : vector<2x512xf32> to vector<2x128xf32>
    %cst_137 = arith.constant 5.000000e-01 : f32
    %278 = vector.broadcast %cst_137 : f32 to vector<2x128xf32>
    %279 = arith.mulf %278, %277 : vector<2x128xf32>
    %cst_138 = arith.constant 5.000000e-01 : f32
    %280 = vector.broadcast %cst_138 : f32 to vector<2x128xf32>
    %281 = arith.addf %279, %280 : vector<2x128xf32>
    %282 = vector.extract_strided_slice %271 {offsets = [0, 256], sizes = [2, 128], strides = [1, 1]} : vector<2x512xf32> to vector<2x128xf32>
    %283 = vector.extract_strided_slice %271 {offsets = [0, 384], sizes = [2, 128], strides = [1, 1]} : vector<2x512xf32> to vector<2x128xf32>
    %cst_139 = arith.constant 5.000000e-01 : f32
    %284 = vector.broadcast %cst_139 : f32 to vector<2x128xf32>
    %285 = arith.mulf %284, %283 : vector<2x128xf32>
    %cst_140 = arith.constant 5.000000e-01 : f32
    %286 = vector.broadcast %cst_140 : f32 to vector<2x128xf32>
    %287 = arith.addf %285, %286 : vector<2x128xf32>
    %288 = arith.mulf %281, %267 : vector<2x128xf32>
    %289 = arith.mulf %276, %282 : vector<2x128xf32>
    %290 = arith.addf %288, %289 : vector<2x128xf32>
    %291 = math.tanh %290 : vector<2x128xf32>
    %292 = arith.mulf %287, %291 : vector<2x128xf32>
    %c6_i32 = arith.constant 6 : i32
    %293 = vector.broadcast %c6_i32 : i32 to vector<2x128xi32>
    %294 = arith.cmpi sgt, %91, %293 : vector<2x128xi32>
    %295 = arith.select %294, %292, %266 : vector<2x128xi1>, vector<2x128xf32>
    %296 = arith.select %294, %290, %267 : vector<2x128xi1>, vector<2x128xf32>
    %297 = vector.extract_strided_slice %87 {offsets = [14, 0], sizes = [2, 512], strides = [1, 1]} : vector<16x512xf32> to vector<2x512xf32>
    %cst_141 = arith.constant dense<0.000000e+00> : vector<2x512xf32>
    %298 = tpu.matmul %295, %88, %cst_141 {dimension_numbers = #tpu.dot_dimension_numbers<[1], [0], [0], [1], [0, 0, 1, 1], [], []>} : vector<2x128xf32>, vector<128x512xf32>, vector<2x512xf32> -> vector<2x512xf32>
    %299 = arith.addf %297, %298 : vector<2x512xf32>
    %300 = math.tanh %299 : vector<2x512xf32>
    %301 = vector.extract_strided_slice %300 {offsets = [0, 0], sizes = [2, 128], strides = [1, 1]} : vector<2x512xf32> to vector<2x128xf32>
    %cst_142 = arith.constant 5.000000e-01 : f32
    %302 = vector.broadcast %cst_142 : f32 to vector<2x128xf32>
    %303 = arith.mulf %302, %301 : vector<2x128xf32>
    %cst_143 = arith.constant 5.000000e-01 : f32
    %304 = vector.broadcast %cst_143 : f32 to vector<2x128xf32>
    %305 = arith.addf %303, %304 : vector<2x128xf32>
    %306 = vector.extract_strided_slice %300 {offsets = [0, 128], sizes = [2, 128], strides = [1, 1]} : vector<2x512xf32> to vector<2x128xf32>
    %cst_144 = arith.constant 5.000000e-01 : f32
    %307 = vector.broadcast %cst_144 : f32 to vector<2x128xf32>
    %308 = arith.mulf %307, %306 : vector<2x128xf32>
    %cst_145 = arith.constant 5.000000e-01 : f32
    %309 = vector.broadcast %cst_145 : f32 to vector<2x128xf32>
    %310 = arith.addf %308, %309 : vector<2x128xf32>
    %311 = vector.extract_strided_slice %300 {offsets = [0, 256], sizes = [2, 128], strides = [1, 1]} : vector<2x512xf32> to vector<2x128xf32>
    %312 = arith.mulf %310, %296 : vector<2x128xf32>
    %313 = arith.mulf %305, %311 : vector<2x128xf32>
    %314 = arith.addf %312, %313 : vector<2x128xf32>
    %c7_i32 = arith.constant 7 : i32
    %315 = vector.broadcast %c7_i32 : i32 to vector<2x128xi32>
    %316 = arith.cmpi sgt, %91, %315 : vector<2x128xi32>
    %317 = arith.select %316, %314, %296 : vector<2x128xi1>, vector<2x128xf32>
    %c0_i32_146 = arith.constant 0 : i32
    %318 = tpu.memref_slice %arg14[%c0_i32_146] : memref<2x!tpu.dma_semaphore, #tpu.memory_space<semaphore_mem>> -> memref<1x!tpu.dma_semaphore, #tpu.memory_space<semaphore_mem>>
    %319 = tpu.memref_squeeze %318 : memref<1x!tpu.dma_semaphore, #tpu.memory_space<semaphore_mem>> -> memref<!tpu.dma_semaphore, #tpu.memory_space<semaphore_mem>>
    tpu.wait_dma2 semaphore(%319 : memref<!tpu.dma_semaphore, #tpu.memory_space<semaphore_mem>>) src(%arg6 : memref<384x128xf32, #tpu.memory_space<any>>) dst(%arg12 : memref<384x128xf32, #tpu.memory_space<vmem>>)
    %c1_i32_147 = arith.constant 1 : i32
    %320 = tpu.memref_slice %arg14[%c1_i32_147] : memref<2x!tpu.dma_semaphore, #tpu.memory_space<semaphore_mem>> -> memref<1x!tpu.dma_semaphore, #tpu.memory_space<semaphore_mem>>
    %321 = tpu.memref_squeeze %320 : memref<1x!tpu.dma_semaphore, #tpu.memory_space<semaphore_mem>> -> memref<!tpu.dma_semaphore, #tpu.memory_space<semaphore_mem>>
    tpu.wait_dma2 semaphore(%321 : memref<!tpu.dma_semaphore, #tpu.memory_space<semaphore_mem>>) src(%arg8 : memref<128x256xf32, #tpu.memory_space<any>>) dst(%arg13 : memref<128x256xf32, #tpu.memory_space<vmem>>)
    %c0_148 = arith.constant 0 : index
    %c0_149 = arith.constant 0 : index
    %322 = vector.load %arg2[%c0_148, %c0_149] : memref<2x256xf32, #tpu.memory_space<vmem>>, vector<2x256xf32>
    %323 = tpu.concatenate %322, %317 in 1 : vector<2x256xf32>, vector<2x128xf32> -> vector<2x384xf32>
    %c0_150 = arith.constant 0 : index
    %c0_151 = arith.constant 0 : index
    %324 = vector.load %arg12[%c0_150, %c0_151] : memref<384x128xf32, #tpu.memory_space<vmem>>, vector<384x128xf32>
    %cst_152 = arith.constant dense<0.000000e+00> : vector<2x128xf32>
    %325 = tpu.matmul %323, %324, %cst_152 {dimension_numbers = #tpu.dot_dimension_numbers<[1], [0], [0], [1], [0, 0, 1, 1], [], []>} : vector<2x384xf32>, vector<384x128xf32>, vector<2x128xf32> -> vector<2x128xf32>
    %c0_153 = arith.constant 0 : index
    %c0_154 = arith.constant 0 : index
    %326 = vector.load %arg7[%c0_153, %c0_154] : memref<1x128xf32, #tpu.memory_space<vmem>>, vector<1x128xf32>
    %327 = vector.broadcast %326 : vector<1x128xf32> to vector<2x128xf32>
    %328 = arith.addf %325, %327 : vector<2x128xf32>
    %cst_155 = arith.constant 0.000000e+00 : f32
    %329 = vector.broadcast %cst_155 : f32 to vector<2x128xf32>
    %330 = arith.maximumf %328, %329 : vector<2x128xf32>
    %c0_156 = arith.constant 0 : index
    %c0_157 = arith.constant 0 : index
    %331 = vector.load %arg13[%c0_156, %c0_157] : memref<128x256xf32, #tpu.memory_space<vmem>>, vector<128x256xf32>
    %cst_158 = arith.constant dense<0.000000e+00> : vector<2x256xf32>
    %332 = tpu.matmul %330, %331, %cst_158 {dimension_numbers = #tpu.dot_dimension_numbers<[1], [0], [0], [1], [0, 0, 1, 1], [], []>} : vector<2x128xf32>, vector<128x256xf32>, vector<2x256xf32> -> vector<2x256xf32>
    %c0_159 = arith.constant 0 : index
    %c0_160 = arith.constant 0 : index
    %333 = vector.load %arg9[%c0_159, %c0_160] : memref<1x256xf32, #tpu.memory_space<vmem>>, vector<1x256xf32>
    %334 = vector.broadcast %333 : vector<1x256xf32> to vector<2x256xf32>
    %335 = arith.addf %332, %334 : vector<2x256xf32>
    %c0_161 = arith.constant 0 : index
    %c0_162 = arith.constant 0 : index
    %336 = vector.load %arg10[%c0_161, %c0_162] : memref<2x256xf32, #tpu.memory_space<vmem>>, vector<2x256xf32>
    tpu.vector_store %arg10[%c0_161, %c0_162], %335 {strides = array<i32>} : memref<2x256xf32, #tpu.memory_space<vmem>>, vector<2x256xf32>,
    return
  }
}

</mosaic_0001>

<bundles_post_ra>
// kernel: tpu_custom_call.1
= control target key start
LH: loop header
LB: loop body
LE: loop exit
PB: predicated region body
PF: predicated region fallthrough
CT: control target
= control target key end

     0   :  { %s4004_s0 = inlined_call_operand.vmem [shape: s32[2,8], index: 0, kind: input, shape index: {}]   ;;  %s4005_s1 = inlined_call_operand.vmem [shape: s32[2,1], index: 1, kind: input, shape index: {}]   ;;  %s4006_s2 = inlined_call_operand.vmem [shape: f32[2,256], index: 2, kind: input, shape index: {}]   ;;  %s4007_s3 = inlined_call_operand.vmem [shape: f32[200,1,64], index: 3, kind: input, shape index: {}]   ;;  %s4008_s4 = inlined_call_operand.vmem [shape: f32[64,512], index: 4, kind: input, shape index: {}]   ;;  %s4009_s5 = inlined_call_operand.hbm [shape: f32[128,512], index: 5, kind: input, shape index: {}]   ;;  %s4010_s6 = inlined_call_operand.hbm [shape: f32[384,128], index: 6, kind: input, shape index: {}]   ;;  %s4011_s7 = inlined_call_operand.vmem [shape: f32[1,128], index: 7, kind: input, shape index: {}]   ;;  %s4012_s8 = inlined_call_operand.hbm [shape: f32[128,256], index: 8, kind: input, shape index: {}]   ;;  %s4013_s9 = inlined_call_operand.vmem [shape: f32[1,256], index: 9, kind: input, shape index: {}]   ;;  %s4014_s10 = inlined_call_operand.hbm [shape: f32[2,256], index: 10, kind: output, shape index: {}]  }
   0x1   :  { %4017 = sst [smem:[#allocation23_spill]] %s4006_s2 }
   0x2   :  { %4018 = sst [smem:[#allocation24_spill]] %s4011_s7 }
   0x3   :  { %4019 = sst [smem:[#allocation25_spill]] %s4012_s8 }
   0x4   :  { %4020 = sst [smem:[#allocation26_spill]] %s4013_s9 }
   0x5   :  { %4021 = sst [smem:[#allocation27_spill]] %s4014_s10 }
   0x6   :  { %15 = vsyncpa [#allocation9], 0 }
   0x7   :  { %16 = vsyncpa [#allocation7], 0 }
   0x8   :  { %17 = vsyncpa [#allocation8], 0  ;;  %s24_s15 = sshll.u32 %s4004_s0, 4  ;;  %s25_s15 = int_to_ptr.vmem [resolvable:$true] %s24_s15 }
   0x9   :  { %s3060_s16 = scalar_lea.vmem %s25_s15, 32  ;;  %p3065_p1 = scmp.lt.s32.totalorder %s25_s15, %s25_s15 }
   0xa   :  { %p3061_p0 = scmp.ne.s32.totalorder %s25_s15, %s3060_s16  ;;  %p3066_p2 = scmp.lt.s32.totalorder %s3060_s16, %s3060_s16 }
   0xc   :  { %p3067_p3 = por %p3066_p2, %p3065_p1 }
   0xe   :  { %p3068_p4 = pnand %p3067_p3, %p3061_p0 }
  0x10   :  { %3071 = shalt.err (!%p3068_p4)
}
  0x11   :  { %s3170_s17 = smov [#allocation6]   ;;  %s3171_s18 = smov [#allocation10]  }
  0x12   :  { %27 = dma.vmem_to_smem %s25_s15, 32, %s3170_s17, [#allocation9]  }
  0x13   :  { %s41_s19 = sshll.u32 %s3171_s18, 4  ;;  %s3072_s22 = scalar_lea.hbm %s4009_s5, 8192  ;;  %s42_s19 = int_to_ptr.vmem [resolvable:$true] %s41_s19 }
  0x14   :  { %p3073_p5 = scmp.ne.s32.totalorder %s4009_s5, %s3072_s22  ;;  %p3076_p6 = scmp.lt.u32.totalorder %s3072_s22, %s4009_s5 }
  0x16   :  { %p3078_p7 = pnand %p3076_p6, %p3073_p5 }
  0x18   :  { %3081 = shalt.err (!%p3078_p7)
}
  0x19   :  { %s3082_s26 = scalar_lea.vmem %s42_s19, 8192  ;;  %p3087_p9 = scmp.lt.s32.totalorder %s42_s19, %s42_s19 }
  0x1a   :  { %p3083_p8 = scmp.ne.s32.totalorder %s42_s19, %s3082_s26  ;;  %p3088_p10 = scmp.lt.s32.totalorder %s3082_s26, %s3082_s26 }
  0x1c   :  { %p3089_p11 = por %p3088_p10, %p3087_p9 }
  0x1e   :  { %p3090_p12 = pnand %p3089_p11, %p3083_p8 }
  0x20   :  { %3093 = shalt.err (!%p3090_p12)
}
  0x21   :  { %s3172_s27 = smov 512   ;;  %s3173_s28 = smov 32  }
  0x22   :  { %47 = dma.hbm_to_vmem [thread:$0]  %s4009_s5, 8192, %s42_s19, [#allocation7], %s3172_s27, %s3172_s27, %s3173_s28  }
  0x23   :  { %3160 = dma.done.wait [#allocation9], 32  }
  0x24   :  { %3161 = vsyncadd [#allocation9], 4294967264 }
  0x25   :  { %3162 = dma.done.wait [#allocation7], 8192  }
  0x26   :  { %3163 = vsyncadd [#allocation7], 4294959104 }
  0x27   :  { %58 = sfence }
  0x28   :  { %v345_v0 = vld [vmem:[#allocation10 + $0x8] sm:$0xff]  ;;  %v344_v2 = vld [vmem:[#allocation10] sm:$0xff]  ;;  %s3251_s11 = sld [smem:[#allocation6]]  ;;  %v3174_v7 = vmov 0.0   ;;  %v152_v12 = vld [vmem:[%s4008_s4 + $0x8] sm:$0xff]  ;;  %s3266_s14 = sld [smem:[#allocation6 + $0x1]] }
  0x29   :  { %v349_v1 = vld [vmem:[#allocation10 + $0x28] sm:$0xff]  ;;  %v348_v4 = vld [vmem:[#allocation10 + $0x20] sm:$0xff]  ;;  %254 = vmatprep.mubr.f32.mxu1 %v3174_v7  ;;  %s3256_s12 = sld [smem:[#allocation6 + $0x80]]  ;;  %476 = vmatprep.mubr.f32.mxu0 %v3174_v7  ;;  %v156_v13 = vld [vmem:[%s4008_s4 + $0x28] sm:$0xff]  ;;  %s3278_s21 = sld [smem:[#allocation6 + $0x81]]  ;;  %v3175_v22 = vmov 0  }
  0x2a   :  { %v3253_v3 = vpack.c.bf16 %v349_v1, %v345_v0  ;;  %v353_v5 = vld [vmem:[#allocation10 + $0x48] sm:$0xff]  ;;  %v3259_v8 = vpack.c.bf16 %v348_v4, %v344_v2  ;;  %v352_v10 = vld [vmem:[#allocation10 + $0x40] sm:$0xff]  ;;  %v151_v14 = vld [vmem:[%s4008_s4] sm:$0xff]  ;;  %v2336_v17 = vpack.c.bf16 %v156_v13, %v152_v12  ;;  %s3283_s22 = sld [smem:[#allocation6 + $0x2]]  ;;  %2979 = vset.pattern.permute.xlu0 %v3175_v22  ;;  %s3306_s16 = sld [smem:[#allocation6 + $0x3]]  ;;  %vm85_vm0 = vcmask 516096  }
  0x2b   :  { %v357_v6 = vld [vmem:[#allocation10 + $0x68] sm:$0xff]  ;;  %v356_v11 = vld [vmem:[#allocation10 + $0x60] sm:$0xff]  ;;  %v155_v15 = vld [vmem:[%s4008_s4 + $0x20] sm:$0xff]  ;;  %s3294_s26 = sld [smem:[#allocation6 + $0x82]]  ;;  %s3312_s20 = sld [smem:[#allocation6 + $0x83]]  ;;  %vm183_vm1 = vcmask 523264  }
  0x2c   :  { %v3261_v9 = vpack.c.bf16 %v357_v6, %v353_v5  ;;  %2369 = vmatprep.subr.bf16.mxu0 %v3253_v3  ;;  %v3281_v16 = vpack.c.bf16 %v356_v11, %v352_v10  ;;  %v2338_v18 = vpack.c.bf16 %v155_v15, %v151_v14  ;;  %v361_v19 = vld [vmem:[#allocation10 + $0x88] sm:$0xff]  ;;  %v360_v21 = vld [vmem:[#allocation10 + $0x80] sm:$0xff]  ;;  %v160_v25 = vld [vmem:[%s4008_s4 + $0x48] sm:$0xff]  ;;  %2337 = vmatprep.subr.bf16.mxu1 %v2336_v17  ;;  %s3330_s13 = sld [smem:[#allocation6 + $0x4]]  ;;  %s3351_s19 = sld [smem:[#allocation6 + $0x5]] }
  0x2d   :  { %2371 = vmatpush1.bf16.msra.mxu0 %v3259_v8  ;;  %v365_v20 = vld [vmem:[#allocation10 + $0xa8] sm:$0xff]  ;;  %v364_v24 = vld [vmem:[#allocation10 + $0xa0] sm:$0xff]  ;;  %v164_v26 = vld [vmem:[%s4008_s4 + $0x68] sm:$0xff]  ;;  %s3342_s25 = sld [smem:[#allocation6 + $0x84]]  ;;  %s3360_s28 = sld [smem:[#allocation6 + $0x85]] }
  0x2e   :  { %2373 = vmatprep.subr.bf16.mxu0 %v3261_v9  ;;  %v3286_v23 = vpack.c.bf16 %v365_v20, %v361_v19  ;;  %v2340_v27 = vpack.c.bf16 %v164_v26, %v160_v25  ;;  %v159_v28 = vld [vmem:[%s4008_s4 + $0x40] sm:$0xff]  ;;  %v369_v30 = vld [vmem:[#allocation10 + $0xc8] sm:$0xff]  ;;  %2339 = vmatpush1.bf16.msra.mxu1 %v2338_v18  ;;  %v3315_v33 = vpack.c.bf16 %v364_v24, %v360_v21  ;;  %v168_v34 = vld [vmem:[%s4008_s4 + $0x88] sm:$0xff]  ;;  %s3375_s5 = sld [smem:[#allocation6 + $0x6]]  ;;  %s4022_s9 = scalar_lea.vmem %s4007_s3, %s3251_s11 }
  0x2f   :  { %v163_v29 = vld [vmem:[%s4008_s4 + $0x60] sm:$0xff]  ;;  %v373_v32 = vld [vmem:[#allocation10 + $0xe8] sm:$0xff]  ;;  %v172_v35 = vld [vmem:[%s4008_s4 + $0xa8] sm:$0xff]  ;;  %s3390_s23 = sld [smem:[#allocation6 + $0x86]]  ;;  %s4023_s29 = scalar_lea.vmem %s4007_s3, %s3256_s12 }
  0x30   :  { %v2342_v31 = vpack.c.bf16 %v163_v29, %v159_v28  ;;  %2341 = vmatprep.subr.bf16.mxu1 %v2340_v27  ;;  %v167_v36 = vld [vmem:[%s4008_s4 + $0x80] sm:$0xff]  ;;  %v3333_v37 = vpack.c.bf16 %v373_v32, %v369_v30  ;;  %v368_v38 = vld [vmem:[#allocation10 + $0xc0] sm:$0xff]  ;;  %v2344_v40 = vpack.c.bf16 %v172_v35, %v168_v34  ;;  %v377_v42 = vld [vmem:[#allocation10 + $0x108] sm:$0xff]  ;;  %s108_s24 = scalar_lea.vmem %s4007_s3, %s3306_s16  ;;  %s4024_s17 = scalar_lea.vmem %s4007_s3, %s3266_s14 }
  0x31   :  { %2375 = vmatpush1.bf16.msra.mxu0 %v3281_v16  ;;  %v372_v39 = vld [vmem:[#allocation10 + $0xe0] sm:$0xff]  ;;  %v171_v41 = vld [vmem:[%s4008_s4 + $0xa0] sm:$0xff]  ;;  %v381_v43 = vld [vmem:[#allocation10 + $0x128] sm:$0xff]  ;;  %s104_s27 = scalar_lea.vmem %s4007_s3, %s3294_s26  ;;  %s112_s16 = scalar_lea.vmem %s4007_s3, %s3312_s20 }
  0x32   :  { %2377 = vmatprep.subr.bf16.mxu0 %v3286_v23  ;;  %v176_v44 = vld [vmem:[%s4008_s4 + $0xc8] sm:$0xff]  ;;  %2343 = vmatpush1.bf16.msra.mxu1 %v2342_v31  ;;  %v2346_v45 = vpack.c.bf16 %v171_v41, %v167_v36  ;;  %v376_v46 = vld [vmem:[#allocation10 + $0x100] sm:$0xff]  ;;  %v3363_v49 = vpack.c.bf16 %v372_v39, %v368_v38  ;;  %v175_v51 = vld [vmem:[%s4008_s4 + $0xc0] sm:$0xff]  ;;  %v3378_v54 = vpack.c.bf16 %v381_v43, %v377_v42  ;;  %s4025_s11 = scalar_lea.vmem %s4007_s3, %s3278_s21  ;;  %s4026_s12 = scalar_lea.vmem %s4007_s3, %s3283_s22 }
  0x33   :  { %v380_v47 = vld [vmem:[#allocation10 + $0x120] sm:$0xff]  ;;  %v180_v48 = vld [vmem:[%s4008_s4 + $0xe8] sm:$0xff]  ;;  %2345 = vmatprep.subr.bf16.mxu1 %v2344_v40  ;;  %v179_v52 = vld [vmem:[%s4008_s4 + $0xe0] sm:$0xff]  ;;  %s3431_s8 = sld [smem:[#allocation6 + $0x7]]  ;;  %s116_s15 = scalar_lea.vmem %s4007_s3, %s3330_s13 }
  0x34   :  { %v2348_v50 = vpack.c.bf16 %v180_v48, %v176_v44  ;;  %v385_v53 = vld [vmem:[#allocation10 + $0x148] sm:$0xff]  ;;  %v84_v58 = vld [vmem:[%s4022_s9] sm:$0x1]  ;;  %v2350_v61 = vpack.c.bf16 %v179_v52, %v175_v51  ;;  %v3421_v1 = vpack.c.bf16 %v380_v47, %v376_v46  ;;  %v384_v10 = vld [vmem:[#allocation10 + $0x140] sm:$0xff]  ;;  %s3433_s14 = sld [smem:[#allocation6 + $0x87]]  ;;  %s124_s26 = scalar_lea.vmem %s4007_s3, %s3351_s19 }
  0x35   :  { %2379 = vmatpush1.bf16.msra.mxu0 %v3315_v33  ;;  %v389_v55 = vld [vmem:[#allocation10 + $0x168] sm:$0xff]  ;;  %v89_v59 = vld [vmem:[%s4023_s29] sm:$0x1]  ;;  %86 = vst.msk [vmem:[#allocation2] sm:$0x1] %vm85_vm0, %v84_v58  ;;  %v388_v11 = vld [vmem:[#allocation10 + $0x160] sm:$0xff]  ;;  %s128_s30 = scalar_lea.vmem %s4007_s3, %s3360_s28 }
  0x36   :  { %2381 = vmatprep.subr.bf16.mxu0 %v3333_v37  ;;  %v154_v56 = vld [vmem:[%s4008_s4 + $0x18] sm:$0xff]  ;;  %v93_v60 = vld [vmem:[%s4024_s17] sm:$0x1]  ;;  %2347 = vmatpush1.bf16.msra.mxu1 %v2346_v45  ;;  %90 = vst.msk [vmem:[#allocation2 + $0x1] sm:$0x1] %vm85_vm0, %v89_v59  ;;  %v3427_v6 = vpack.c.bf16 %v389_v55, %v385_v53  ;;  %v3444_v14 = vpack.c.bf16 %v388_v11, %v384_v10  ;;  %v392_v17 = vld [vmem:[#allocation10 + $0x180] sm:$0xff]  ;;  %s132_s17 = scalar_lea.vmem %s4007_s3, %s3375_s5 }
  0x37   :  { %v158_v57 = vld [vmem:[%s4008_s4 + $0x38] sm:$0xff]  ;;  %94 = vst.msk [vmem:[#allocation2 + $0x2] sm:$0x1] %vm85_vm0, %v93_v60  ;;  %v97_v62 = vld [vmem:[%s4025_s11] sm:$0x1]  ;;  %2349 = vmatprep.subr.bf16.mxu1 %v2348_v50  ;;  %v396_v18 = vld [vmem:[#allocation10 + $0x1a0] sm:$0xff]  ;;  %s136_s11 = scalar_lea.vmem %s4007_s3, %s3390_s23 }
  0x38   :  { %v101_v63 = vld [vmem:[%s4026_s12] sm:$0x1]  ;;  %v2352_v2 = vpack.c.bf16 %v158_v57, %v154_v56  ;;  %98 = vst.msk [vmem:[#allocation2 + $0x3] sm:$0x1] %vm85_vm0, %v97_v62  ;;  %v393_v12 = vld [vmem:[#allocation10 + $0x188] sm:$0xff]  ;;  %v400_v22 = vld [vmem:[#allocation10 + $0x1c0] sm:$0xff]  ;;  %v3471_v28 = vpack.c.bf16 %v396_v18, %v392_v17 }
  0x39   :  { %v105_v0 = vld [vmem:[%s104_s27] sm:$0x1]  ;;  %2383 = vmatpush1.bf16.msra.mxu0 %v3363_v49  ;;  %102 = vst.msk [vmem:[#allocation2 + $0x4] sm:$0x1] %vm85_vm0, %v101_v63  ;;  %v397_v13 = vld [vmem:[#allocation10 + $0x1a8] sm:$0xff]  ;;  %s120_s27 = scalar_lea.vmem %s4007_s3, %s3342_s25  ;;  %s140_s2 = scalar_lea.vmem %s4007_s3, %s3431_s8  ;;  %v404_v32 = vld [vmem:[#allocation10 + $0x1e0] sm:$0xff] }
  0x3a   :  { %106 = vst.msk [vmem:[#allocation2 + $0x5] sm:$0x1] %vm85_vm0, %v105_v0  ;;  %v109_v4 = vld [vmem:[%s108_s24] sm:$0x1]  ;;  %2385 = vmatprep.subr.bf16.mxu0 %v3378_v54  ;;  %2351 = vmatpush1.bf16.msra.mxu1 %v2350_v61  ;;  %v3455_v15 = vpack.c.bf16 %v397_v13, %v393_v12  ;;  %v401_v19 = vld [vmem:[#allocation10 + $0x1c8] sm:$0xff]  ;;  %s144_s7 = scalar_lea.vmem %s4007_s3, %s3433_s14  ;;  %v3488_v36 = vpack.c.bf16 %v404_v32, %v400_v22  ;;  %v153_v38 = vld [vmem:[%s4008_s4 + $0x10] sm:$0xff] }
  0x3b   :  { %v113_v5 = vld [vmem:[%s112_s16] sm:$0x1]  ;;  %110 = vst.msk [vmem:[#allocation2 + $0x6] sm:$0x1] %vm85_vm0, %v109_v4  ;;  %2353 = vmatprep.subr.bf16.mxu1 %v2352_v2  ;;  %v405_v20 = vld [vmem:[#allocation10 + $0x1e8] sm:$0xff]  ;;  %v157_v39 = vld [vmem:[%s4008_s4 + $0x30] sm:$0xff] }
  0x3c   :  { %114 = vst.msk [vmem:[#allocation2 + $0x7] sm:$0x1] %vm85_vm0, %v113_v5  ;;  %v117_v21 = vld [vmem:[%s116_s15] sm:$0x1]  ;;  %v3481_v31 = vpack.c.bf16 %v405_v20, %v401_v19  ;;  %v162_v40 = vld [vmem:[%s4008_s4 + $0x58] sm:$0xff]  ;;  %v2354_v42 = vpack.c.bf16 %v157_v39, %v153_v38  ;;  %v161_v45 = vld [vmem:[%s4008_s4 + $0x50] sm:$0xff] }
  0x3d   :  { %2387 = vmatpush1.bf16.msra.mxu0 %v3421_v1  ;;  %118 = vst.msk [vmem:[#allocation2 + $0x8] sm:$0x1] %vm85_vm0, %v117_v21  ;;  %v121_v24 = vld [vmem:[%s120_s27] sm:$0x1]  ;;  %v166_v41 = vld [vmem:[%s4008_s4 + $0x78] sm:$0xff]  ;;  %v165_v46 = vld [vmem:[%s4008_s4 + $0x70] sm:$0xff] }
  0x3e   :  { %2389 = vmatprep.subr.bf16.mxu0 %v3427_v6  ;;  %v125_v25 = vld [vmem:[%s124_s26] sm:$0x1]  ;;  %122 = vst.msk [vmem:[#allocation2 + $0x9] sm:$0x1] %vm85_vm0, %v121_v24  ;;  %v2356_v44 = vpack.c.bf16 %v166_v41, %v162_v40  ;;  %v170_v48 = vld [vmem:[%s4008_s4 + $0x98] sm:$0xff]  ;;  %v2358_v51 = vpack.c.bf16 %v165_v46, %v161_v45  ;;  %v169_v53 = vld [vmem:[%s4008_s4 + $0x90] sm:$0xff] }
  0x3f   :  { %v129_v26 = vld [vmem:[%s128_s30] sm:$0x1]  ;;  %126 = vst.msk [vmem:[#allocation2 + $0xa] sm:$0x1] %vm85_vm0, %v125_v25  ;;  %v174_v50 = vld [vmem:[%s4008_s4 + $0xb8] sm:$0xff]  ;;  %v173_v55 = vld [vmem:[%s4008_s4 + $0xb0] sm:$0xff] }
  0x40   :  { %130 = vst.msk [vmem:[#allocation2 + $0xb] sm:$0x1] %vm85_vm0, %v129_v26  ;;  %v133_v29 = vld [vmem:[%s132_s17] sm:$0x1]  ;;  %v2360_v52 = vpack.c.bf16 %v174_v50, %v170_v48  ;;  %v178_v57 = vld [vmem:[%s4008_s4 + $0xd8] sm:$0xff]  ;;  %v2362_v59 = vpack.c.bf16 %v173_v55, %v169_v53  ;;  %v177_v61 = vld [vmem:[%s4008_s4 + $0xd0] sm:$0xff] }
  0x41   :  { %2391 = vmatpush1.bf16.msra.mxu0 %v3444_v14  ;;  %v137_v30 = vld [vmem:[%s136_s11] sm:$0x1]  ;;  %134 = vst.msk [vmem:[#allocation2 + $0xc] sm:$0x1] %vm85_vm0, %v133_v29  ;;  %v182_v58 = vld [vmem:[%s4008_s4 + $0xf8] sm:$0xff]  ;;  %v181_v62 = vld [vmem:[%s4008_s4 + $0xf0] sm:$0xff] }
  0x42   :  { %2393 = vmatprep.subr.bf16.mxu0 %v3455_v15  ;;  %138 = vst.msk [vmem:[#allocation2 + $0xd] sm:$0x1] %vm85_vm0, %v137_v30  ;;  %v141_v34 = vld [vmem:[%s140_s2] sm:$0x1]  ;;  %v2364_v60 = vpack.c.bf16 %v182_v58, %v178_v57  ;;  %v347_v63 = vld [vmem:[#allocation10 + $0x18] sm:$0xff]  ;;  %v2366_v4 = vpack.c.bf16 %v181_v62, %v177_v61  ;;  %s3176_s4 = smov [#allocation3]  }
  0x43   :  { %v147_v27 = vld [vmem:[#allocation2] sm:$0xff]  ;;  %142 = vst.msk [vmem:[#allocation2 + $0xe] sm:$0x1] %vm85_vm0, %v141_v34  ;;  %v351_v0 = vld [vmem:[#allocation10 + $0x38] sm:$0xff]  ;;  %s66_s12 = sshll.u32 %s3176_s4, 4  ;;  %s3177_s8 = smov [#allocation4]   ;;  %s67_s12 = int_to_ptr.vmem [resolvable:$true] %s66_s12 }
  0x44   :  { %2980 = vtanh.f32 %v147_v27  ;;  %v145_v35 = vld [vmem:[%s144_s7] sm:$0x1]  ;;  %v3549_v5 = vpack.c.bf16 %v351_v0, %v347_v63  ;;  %v355_v12 = vld [vmem:[#allocation10 + $0x58] sm:$0xff]  ;;  %s78_s14 = sshll.u32 %s3177_s8, 4  ;;  %s3094_s15 = scalar_lea.hbm %s4010_s6, 6144  ;;  %s79_s14 = int_to_ptr.vmem [resolvable:$true] %s78_s14 }
  0x45   :  { %146 = vst.msk [vmem:[#allocation2 + $0xf] sm:$0x1] %vm85_vm0, %v145_v35  ;;  %2395 = vmatpush1.bf16.msra.mxu0 %v3471_v28  ;;  %v408_v56 = vld [vmem:[%s4005_s1] sm:$0x3]  ;;  %v359_v13 = vld [vmem:[#allocation10 + $0x78] sm:$0xff]  ;;  %p3095_p13 = scmp.ne.s32.totalorder %s4010_s6, %s3094_s15  ;;  %p3098_p0 = scmp.lt.u32.totalorder %s3094_s15, %s4010_s6 }
  0x46   :  { %2397 = vmatprep.subr.bf16.mxu0 %v3481_v31  ;;  %410 = vperm.xlu0 %2979, %v408_v56   ;;  %v346_v10 = vld [vmem:[#allocation10 + $0x10] sm:$0xff]  ;;  %v3557_v18 = vpack.c.bf16 %v359_v13, %v355_v12  ;;  %v363_v21 = vld [vmem:[#allocation10 + $0x98] sm:$0xff] }
  0x47   :  { %v350_v11 = vld [vmem:[#allocation10 + $0x30] sm:$0xff]  ;;  %v367_v22 = vld [vmem:[#allocation10 + $0xb8] sm:$0xff]  ;;  %p3100_p1 = pnand %p3098_p0, %p3095_p13 }
  0x48   :  { %v3553_v17 = vpack.c.bf16 %v350_v11, %v346_v10  ;;  %v354_v19 = vld [vmem:[#allocation10 + $0x50] sm:$0xff]  ;;  %v3566_v25 = vpack.c.bf16 %v367_v22, %v363_v21  ;;  %v371_v29 = vld [vmem:[#allocation10 + $0xd8] sm:$0xff] }
  0x49   :  { %2399 = vmatpush1.bf16.msra.mxu0 %v3488_v36  ;;  %v358_v20 = vld [vmem:[#allocation10 + $0x70] sm:$0xff]  ;;  %v375_v30 = vld [vmem:[#allocation10 + $0xf8] sm:$0xff] }
  0x4a   :  { %2433 = vmatprep.subr.bf16.mxu0 %v3253_v3  ;;  %v3562_v24 = vpack.c.bf16 %v358_v20, %v354_v19  ;;  %v362_v26 = vld [vmem:[#allocation10 + $0x90] sm:$0xff]  ;;  %v3576_v34 = vpack.c.bf16 %v375_v30, %v371_v29  ;;  %v379_v39 = vld [vmem:[#allocation10 + $0x118] sm:$0xff] }
  0x4b   :  { %v366_v27 = vld [vmem:[#allocation10 + $0xb0] sm:$0xff]  ;;  %v383_v40 = vld [vmem:[#allocation10 + $0x138] sm:$0xff] }
  0x4c   :  { %v148_v43 = vld [vmem:[#allocation2 + $0x8] sm:$0xff]  ;;  %477 = vmatmul.mubr.f32.vlgmr.msra.gmra.mrb[0].mxu0 %v3174_v7  ;;  %v3572_v32 = vpack.c.bf16 %v366_v27, %v362_v26  ;;  %v370_v35 = vld [vmem:[#allocation10 + $0xd0] sm:$0xff] }
  0x4d   :  { %2982 = vtanh.f32 %v148_v43  ;;  %2435 = vmatpush1.bf16.msra.mxu0 %v3259_v8  ;;  %640 = vmatprep.mubr.f32.mxu0 %v3174_v7  ;;  %v374_v38 = vld [vmem:[#allocation10 + $0xf0] sm:$0xff]  ;;  %v387_v45 = vld [vmem:[#allocation10 + $0x158] sm:$0xff] }
  0x4e   :  { %v2981_v47 = vpop.eup %2980  ;;  %2437 = vmatprep.subr.bf16.mxu0 %v3261_v9  ;;  %v3581_v41 = vpack.c.bf16 %v374_v38, %v370_v35  ;;  %v378_v43 = vld [vmem:[#allocation10 + $0x110] sm:$0xff]  ;;  %v391_v46 = vld [vmem:[#allocation10 + $0x178] sm:$0xff] }
  0x4f   :  { %2238 = vmatmul.mubr.msk.f32.vlgmr.msra.gmra.mrb[0].mxu1 %vm183_vm1, %v2981_v47  ;;  %v3593_v48 = vpack.c.bf16 %v391_v46, %v387_v45  ;;  %v386_v50 = vld [vmem:[#allocation10 + $0x150] sm:$0xff]  ;;  %v399_v53 = vld [vmem:[#allocation10 + $0x1b8] sm:$0xff] }
  0x50   :  { %2355 = vmatpush1.bf16.msra.mxu1 %v2354_v42  ;;  %260 = vmatprep.mubr.f32.mxu1 %v3174_v7  ;;  %v3585_v42 = vpack.c.bf16 %v383_v40, %v379_v39  ;;  %v394_v57 = vld [vmem:[#allocation10 + $0x190] sm:$0xff] }
  0x51   :  { %2357 = vmatprep.subr.bf16.mxu1 %v2356_v44  ;;  %2439 = vmatpush1.bf16.msra.mxu0 %v3281_v16  ;;  %v382_v44 = vld [vmem:[#allocation10 + $0x130] sm:$0xff] }
  0x52   :  { %2441 = vmatprep.subr.bf16.mxu0 %v3286_v23  ;;  %v398_v58 = vld [vmem:[#allocation10 + $0x1b0] sm:$0xff] }
  0x53   :  { %v3602_v61 = vpack.c.bf16 %v398_v58, %v394_v57  ;;  %v402_v63 = vld [vmem:[#allocation10 + $0x1d0] sm:$0xff] }
  0x54   :  { %2359 = vmatpush1.bf16.msra.mxu1 %v2358_v51  ;;  %v390_v51 = vld [vmem:[#allocation10 + $0x170] sm:$0xff] }
  0x55   :  { %2361 = vmatprep.subr.bf16.mxu1 %v2360_v52  ;;  %2443 = vmatpush1.bf16.msra.mxu0 %v3315_v33  ;;  %v395_v52 = vld [vmem:[#allocation10 + $0x198] sm:$0xff]  ;;  %v3596_v55 = vpack.c.bf16 %v390_v51, %v386_v50  ;;  %v406_v0 = vld [vmem:[#allocation10 + $0x1f0] sm:$0xff] }
  0x56   :  { %2445 = vmatprep.subr.bf16.mxu0 %v3333_v37  ;;  %v3599_v56 = vpack.c.bf16 %v399_v53, %v395_v52 }
  0x57   :  { %v2983_v2 = vpop.eup %2982 }
  0x58   :  { %2363 = vmatpush1.bf16.msra.mxu1 %v2362_v59  ;;  %v403_v59 = vld [vmem:[#allocation10 + $0x1d8] sm:$0xff] }
  0x59   :  { %2239 = vmatmul.mubr.msk.f32.gmra.mrb[2].mxu1 %vm183_vm1, %v2983_v2  ;;  %2365 = vmatprep.subr.bf16.mxu1 %v2364_v60  ;;  %v407_v60 = vld [vmem:[#allocation10 + $0x1f8] sm:$0xff] }
  0x5a   :  { %331 = vmatprep.mubr.f32.mxu1 %v3174_v7  ;;  %2447 = vmatpush1.bf16.msra.mxu0 %v3363_v49  ;;  %v3605_v62 = vpack.c.bf16 %v407_v60, %v403_v59 }
  0x5b   :  { %2449 = vmatprep.subr.bf16.mxu0 %v3378_v54 }
  0x5c   :  { %2367 = vmatpush1.bf16.msra.mxu1 %v2366_v4 }
  0x5d   :  { %2401 = vmatprep.subr.bf16.mxu1 %v3549_v5 }
  0x5e   :  { %2451 = vmatpush1.bf16.msra.mxu0 %v3421_v1 }
  0x5f   :  { %2240 = vmatmul.mubr.msk.f32.vlgmr.msra.gmra.mrb[4].mxu1 %vm183_vm1, %v2981_v47  ;;  %2453 = vmatprep.subr.bf16.mxu0 %v3427_v6  ;;  %v3589_v47 = vpack.c.bf16 %v382_v44, %v378_v43 }
  0x60   :  { %2403 = vmatpush1.bf16.msra.mxu1 %v3553_v17  ;;  %337 = vmatprep.mubr.f32.mxu1 %v3174_v7 }
  0x61   :  { %2405 = vmatprep.subr.bf16.mxu1 %v3557_v18 }
  0x62   :  { %2455 = vmatpush1.bf16.msra.mxu0 %v3444_v14 }
  0x63   :  { %2241 = vmatmul.mubr.msk.f32.gmra.mrb[6].mxu1 %vm183_vm1, %v2983_v2  ;;  %2457 = vmatprep.subr.bf16.mxu0 %v3455_v15  ;;  %v3608_v2 = vpack.c.bf16 %v406_v0, %v402_v63 }
  0x64   :  { %2407 = vmatpush1.bf16.msra.mxu1 %v3562_v24  ;;  %547 = vmatprep.mubr.f32.mxu1 %v3174_v7 }
  0x65   :  { %2409 = vmatprep.subr.bf16.mxu1 %v3566_v25 }
  0x66   :  { %2459 = vmatpush1.bf16.msra.mxu0 %v3471_v28 }
  0x67   :  { %2461 = vmatprep.subr.bf16.mxu0 %v3481_v31 }
  0x68   :  { %2411 = vmatpush1.bf16.msra.mxu1 %v3572_v32 }
  0x69   :  { %2413 = vmatprep.subr.bf16.mxu1 %v3576_v34 }
  0x6a   :  { %2463 = vmatpush1.bf16.msra.mxu0 %v3488_v36 }
  0x6b   :  { %2497 = vmatprep.subr.bf16.mxu0 %v3253_v3 }
  0x6c   :  { %2415 = vmatpush1.bf16.msra.mxu1 %v3581_v41 }
  0x6d   :  { %2417 = vmatprep.subr.bf16.mxu1 %v3585_v42 }
  0x70   :  { %2419 = vmatpush1.bf16.msra.mxu1 %v3589_v47 }
  0x71   :  { %2421 = vmatprep.subr.bf16.mxu1 %v3593_v48 }
  0x74   :  { %2423 = vmatpush1.bf16.msra.mxu1 %v3596_v55 }
  0x75   :  { %2425 = vmatprep.subr.bf16.mxu1 %v3599_v56 }
  0x78   :  { %2427 = vmatpush1.bf16.msra.mxu1 %v3602_v61 }
  0x79   :  { %2429 = vmatprep.subr.bf16.mxu1 %v3605_v62 }
  0x7c   :  { %2431 = vmatpush1.bf16.msra.mxu1 %v3608_v2 }
  0x7d   :  { %2465 = vmatprep.subr.bf16.mxu1 %v3549_v5 }
  0x7f   :  { %548 = vmatmul.mubr.f32.vlgmr.msra.gmra.mrb[8].mxu1 %v3174_v7 }
  0x80   :  { %2467 = vmatpush1.bf16.msra.mxu1 %v3553_v17  ;;  %711 = vmatprep.mubr.f32.mxu1 %v3174_v7 }
  0x81   :  { %2469 = vmatprep.subr.bf16.mxu1 %v3557_v18 }
  0x84   :  { %2471 = vmatpush1.bf16.msra.mxu1 %v3562_v24 }
  0x85   :  { %2473 = vmatprep.subr.bf16.mxu1 %v3566_v25 }
  0x88   :  { %2475 = vmatpush1.bf16.msra.mxu1 %v3572_v32 }
  0x89   :  { %2477 = vmatprep.subr.bf16.mxu1 %v3576_v34 }
  0x8c   :  { %2479 = vmatpush1.bf16.msra.mxu1 %v3581_v41 }
  0x8d   :  { %2481 = vmatprep.subr.bf16.mxu1 %v3585_v42 }
  0x90   :  { %2483 = vmatpush1.bf16.msra.mxu1 %v3589_v47 }
  0x91   :  { %2485 = vmatprep.subr.bf16.mxu1 %v3593_v48 }
  0x94   :  { %2487 = vmatpush1.bf16.msra.mxu1 %v3596_v55 }
  0x95   :  { %2489 = vmatprep.subr.bf16.mxu1 %v3599_v56 }
  0x98   :  { %2491 = vmatpush1.bf16.msra.mxu1 %v3602_v61 }
  0x99   :  { %2493 = vmatprep.subr.bf16.mxu1 %v3605_v62 }
  0x9c   :  { %2495 = vmatpush1.bf16.msra.mxu1 %v3608_v2 }
  0x9d   :  { %2529 = vmatprep.subr.bf16.mxu1 %v3549_v5 }
  0xc5   :  { %v3651_v51 = vpop.permute.xlu0 %410 }
  0xc6   :  { %vm573_vm2 = vcmp.gt.s32.totalorder %v3651_v51, 0  ;;  %vm752_vm3 = vcmp.gt.s32.totalorder %v3651_v51, 1  ;;  %vm937_vm4 = vcmp.gt.s32.totalorder %v3651_v51, 2  ;;  %vm1122_vm5 = vcmp.gt.s32.totalorder %v3651_v51, 3 }
  0xc7   :  { %vm1292_vm6 = vcmp.gt.s32.totalorder %v3651_v51, 4  ;;  %vm1471_vm7 = vcmp.gt.s32.totalorder %v3651_v51, 5  ;;  %vm1656_vm8 = vcmp.gt.s32.totalorder %v3651_v51, 6 }
 0x11f   :  { %v478_v4 = vpop.f32.mrb[0].mxu0 }
 0x120   :  { %v480_v11 = vpop.f32.mrb[1].mxu0 }
 0x122   :  { %v3631_v10 = vpop.f32.mrb[0].mxu1 }
 0x123   :  { %v3633_v12 = vpop.f32.mrb[1].mxu1  ;;  %v554_v13 = vadd.f32 %v478_v4, %v3631_v10 }
 0x124   :  { %v555_v19 = vadd.f32 %v480_v11, %v3633_v12 }
 0x126   :  { %2984 = vtanh.f32 %v555_v19 }
 0x127   :  { %2986 = vtanh.f32 %v554_v13 }
 0x12c   :  { %v3637_v20 = vpop.f32.mrb[2].mxu1 }
 0x12d   :  { %v3639_v21 = vpop.f32.mrb[3].mxu1 }
 0x130   :  { %v2985_v40 = vpop.eup %2984 }
 0x131   :  { %v2987_v43 = vpop.eup %2986  ;;  %v564_v44 = vmul.f32 0.5, %v2985_v40 }
 0x132   :  { %v3641_v22 = vpop.f32.mrb[4].mxu1  ;;  %v562_v45 = vmul.f32 0.5, %v2987_v43 }
 0x133   :  { %v3643_v26 = vpop.f32.mrb[5].mxu1  ;;  %v565_v46 = vadd.f32 0.5, %v564_v44 }
 0x134   :  { %v563_v50 = vadd.f32 0.5, %v562_v45 }
 0x135   :  { %v568_v53 = vmul.f32 0.0, %v565_v46 }
 0x136   :  { %v3645_v27 = vpop.f32.mrb[6].mxu1 }
 0x137   :  { %v3647_v29 = vpop.f32.mrb[7].mxu1 }
 0x152   :  { %v549_v30 = vpop.f32.mrb[8].mxu1 }
 0x153   :  { %v556_v35 = vadd.f32 %v549_v30, %v3641_v22  ;;  %v551_v38 = vpop.f32.mrb[9].mxu1 }
 0x154   :  { %v557_v39 = vadd.f32 %v551_v38, %v3643_v26 }
 0x155   :  { %2988 = vtanh.f32 %v556_v35 }
 0x156   :  { %2990 = vtanh.f32 %v557_v39 }
 0x15f   :  { %v2989_v52 = vpop.eup %2988 }
 0x160   :  { %v569_v57 = vmul.f32 %v2989_v52, %v563_v50  ;;  %v2991_v60 = vpop.eup %2990 }
 0x161   :  { %v566_v63 = vmul.f32 0.5, %v2991_v60 }
 0x162   :  { %v570_v58 = vadd.f32 %v569_v57, %v568_v53 }
 0x163   :  { %v567_v0 = vadd.f32 0.5, %v566_v63 }
 0x164   :  { %2992 = vtanh.f32 %v570_v58  ;;  %v3654_v59 = vsel %vm573_vm2, %v570_v58, 0.0 }
 0x16e   :  { %v2993_v4 = vpop.eup %2992 }
 0x16f   :  { %v572_v11 = vmul.f32 %v2993_v4, %v567_v0 }
 0x171   :  { %2242 = vmatmul.mubr.msk.f32.vlgmr.msra.gmra.mrb[2].mxu0 %vm573_vm2, %v572_v11  ;;  %2243 = vmatmul.mubr.msk.f32.vlgmr.msra.gmra.mrb[10].mxu1 %vm573_vm2, %v572_v11  ;;  %v3656_v13 = vsel %vm573_vm2, %v572_v11, 0.0  ;;  %v745_v11 = vrot.slane %v3654_v59, 6 }
 0x172   :  { %2499 = vmatpush1.bf16.msra.mxu0 %v3259_v8  ;;  %2531 = vmatpush1.bf16.msra.mxu1 %v3553_v17 }
 0x173   :  { %2501 = vmatprep.subr.bf16.mxu0 %v3261_v9  ;;  %2533 = vmatprep.subr.bf16.mxu1 %v3557_v18 }
 0x174   :  { %825 = vmatprep.mubr.f32.mxu0 %v3174_v7  ;;  %896 = vmatprep.mubr.f32.mxu1 %v3174_v7 }
 0x176   :  { %2503 = vmatpush1.bf16.msra.mxu0 %v3281_v16  ;;  %2535 = vmatpush1.bf16.msra.mxu1 %v3562_v24 }
 0x177   :  { %2505 = vmatprep.subr.bf16.mxu0 %v3286_v23  ;;  %2537 = vmatprep.subr.bf16.mxu1 %v3566_v25 }
 0x17a   :  { %2507 = vmatpush1.bf16.msra.mxu0 %v3315_v33  ;;  %2539 = vmatpush1.bf16.msra.mxu1 %v3572_v32 }
 0x17b   :  { %2509 = vmatprep.subr.bf16.mxu0 %v3333_v37  ;;  %2541 = vmatprep.subr.bf16.mxu1 %v3576_v34 }
 0x17e   :  { %2511 = vmatpush1.bf16.msra.mxu0 %v3363_v49  ;;  %2543 = vmatpush1.bf16.msra.mxu1 %v3581_v41 }
 0x17f   :  { %2513 = vmatprep.subr.bf16.mxu0 %v3378_v54  ;;  %2545 = vmatprep.subr.bf16.mxu1 %v3585_v42 }
 0x182   :  { %2515 = vmatpush1.bf16.msra.mxu0 %v3421_v1  ;;  %2547 = vmatpush1.bf16.msra.mxu1 %v3589_v47 }
 0x183   :  { %2517 = vmatprep.subr.bf16.mxu0 %v3427_v6  ;;  %2549 = vmatprep.subr.bf16.mxu1 %v3593_v48 }
 0x186   :  { %2519 = vmatpush1.bf16.msra.mxu0 %v3444_v14  ;;  %2551 = vmatpush1.bf16.msra.mxu1 %v3596_v55 }
 0x187   :  { %2521 = vmatprep.subr.bf16.mxu0 %v3455_v15  ;;  %2553 = vmatprep.subr.bf16.mxu1 %v3599_v56 }
 0x18a   :  { %2523 = vmatpush1.bf16.msra.mxu0 %v3471_v28  ;;  %2555 = vmatpush1.bf16.msra.mxu1 %v3602_v61 }
 0x18b   :  { %2525 = vmatprep.subr.bf16.mxu0 %v3481_v31  ;;  %2557 = vmatprep.subr.bf16.mxu1 %v3605_v62 }
 0x18e   :  { %2527 = vmatpush1.bf16.msra.mxu0 %v3488_v36  ;;  %2559 = vmatpush1.bf16.msra.mxu1 %v3608_v2 }
 0x18f   :  { %2561 = vmatprep.subr.bf16.mxu0 %v3253_v3  ;;  %2593 = vmatprep.subr.bf16.mxu1 %v3549_v5 }
 0x244   :  { %v642_v19 = vpop.f32.mrb[2].mxu0  ;;  %v713_v30 = vpop.f32.mrb[10].mxu1 }
 0x245   :  { %v722_v35 = vrot.slane %v642_v19, 6  ;;  %v724_v38 = vrot.slane %v713_v30, 6  ;;  %v644_v39 = vpop.f32.mrb[3].mxu0  ;;  %v715_v40 = vpop.f32.mrb[11].mxu1 }
 0x246   :  { %v723_v43 = vrot.slane %v644_v39, 6  ;;  %v725_v44 = vrot.slane %v715_v40, 6 }
 0x247   :  { %v730_v45 = vadd.f32 %v722_v35, %v3631_v10  ;;  %v732_v46 = vadd.f32 %v724_v38, %v3641_v22 }
 0x248   :  { %v731_v50 = vadd.f32 %v723_v43, %v3633_v12  ;;  %v733_v52 = vadd.f32 %v725_v44, %v3643_v26 }
 0x249   :  { %2994 = vtanh.f32 %v730_v45 }
 0x24a   :  { %2996 = vtanh.f32 %v731_v50 }
 0x24b   :  { %2998 = vtanh.f32 %v732_v46 }
 0x24c   :  { %3000 = vtanh.f32 %v733_v52 }
 0x253   :  { %v2995_v53 = vpop.eup %2994 }
 0x254   :  { %v738_v57 = vmul.f32 0.5, %v2995_v53  ;;  %v2997_v58 = vpop.eup %2996 }
 0x255   :  { %v740_v63 = vmul.f32 0.5, %v2997_v58  ;;  %v2999_v0 = vpop.eup %2998 }
 0x256   :  { %v739_v60 = vadd.f32 0.5, %v738_v57  ;;  %v3001_v39 = vpop.eup %3000 }
 0x257   :  { %v741_v4 = vadd.f32 0.5, %v740_v63  ;;  %v742_v43 = vmul.f32 0.5, %v3001_v39 }
 0x258   :  { %v748_v19 = vmul.f32 %v2999_v0, %v739_v60 }
 0x259   :  { %v747_v30 = vmul.f32 %v745_v11, %v741_v4  ;;  %v743_v44 = vadd.f32 0.5, %v742_v43 }
 0x25b   :  { %v749_v35 = vadd.f32 %v748_v19, %v747_v30 }
 0x25d   :  { %3002 = vtanh.f32 %v749_v35  ;;  %v758_v38 = vrot.slane %v749_v35, 2 }
 0x25f   :  { %v3699_v40 = vsel %vm752_vm3, %v758_v38, %v3654_v59 }
 0x267   :  { %v3003_v45 = vpop.eup %3002 }
 0x268   :  { %v751_v46 = vmul.f32 %v3003_v45, %v743_v44 }
 0x26a   :  { %v754_v50 = vrot.slane %v751_v46, 2  ;;  %v930_v46 = vrot.slane %v3699_v40, 4 }
 0x26c   :  { %v3702_v52 = vsel %vm752_vm3, %v754_v50, %v3656_v13 }
 0x26d   :  { %826 = vmatmul.mubr.f32.vlgmr.msra.gmra.mrb[4].mxu0 %v3702_v52  ;;  %897 = vmatmul.mubr.f32.vlgmr.msra.gmra.mrb[12].mxu1 %v3702_v52 }
 0x26e   :  { %2563 = vmatpush1.bf16.msra.mxu0 %v3259_v8  ;;  %2595 = vmatpush1.bf16.msra.mxu1 %v3553_v17 }
 0x26f   :  { %2565 = vmatprep.subr.bf16.mxu0 %v3261_v9  ;;  %2597 = vmatprep.subr.bf16.mxu1 %v3557_v18 }
 0x270   :  { %1010 = vmatprep.mubr.f32.mxu0 %v3174_v7  ;;  %1081 = vmatprep.mubr.f32.mxu1 %v3174_v7 }
 0x272   :  { %2567 = vmatpush1.bf16.msra.mxu0 %v3281_v16  ;;  %2599 = vmatpush1.bf16.msra.mxu1 %v3562_v24 }
 0x273   :  { %2569 = vmatprep.subr.bf16.mxu0 %v3286_v23  ;;  %2601 = vmatprep.subr.bf16.mxu1 %v3566_v25 }
 0x276   :  { %2571 = vmatpush1.bf16.msra.mxu0 %v3315_v33  ;;  %2603 = vmatpush1.bf16.msra.mxu1 %v3572_v32 }
 0x277   :  { %2573 = vmatprep.subr.bf16.mxu0 %v3333_v37  ;;  %2605 = vmatprep.subr.bf16.mxu1 %v3576_v34 }
 0x27a   :  { %2575 = vmatpush1.bf16.msra.mxu0 %v3363_v49  ;;  %2607 = vmatpush1.bf16.msra.mxu1 %v3581_v41 }
 0x27b   :  { %2577 = vmatprep.subr.bf16.mxu0 %v3378_v54  ;;  %2609 = vmatprep.subr.bf16.mxu1 %v3585_v42 }
 0x27e   :  { %2579 = vmatpush1.bf16.msra.mxu0 %v3421_v1  ;;  %2611 = vmatpush1.bf16.msra.mxu1 %v3589_v47 }
 0x27f   :  { %2581 = vmatprep.subr.bf16.mxu0 %v3427_v6  ;;  %2613 = vmatprep.subr.bf16.mxu1 %v3593_v48 }
 0x282   :  { %2583 = vmatpush1.bf16.msra.mxu0 %v3444_v14  ;;  %2615 = vmatpush1.bf16.msra.mxu1 %v3596_v55 }
 0x283   :  { %2585 = vmatprep.subr.bf16.mxu0 %v3455_v15  ;;  %2617 = vmatprep.subr.bf16.mxu1 %v3599_v56 }
 0x286   :  { %2587 = vmatpush1.bf16.msra.mxu0 %v3471_v28  ;;  %2619 = vmatpush1.bf16.msra.mxu1 %v3602_v61 }
 0x287   :  { %2589 = vmatprep.subr.bf16.mxu0 %v3481_v31  ;;  %2621 = vmatprep.subr.bf16.mxu1 %v3605_v62 }
 0x28a   :  { %2591 = vmatpush1.bf16.msra.mxu0 %v3488_v36  ;;  %2623 = vmatpush1.bf16.msra.mxu1 %v3608_v2 }
 0x28b   :  { %2625 = vmatprep.subr.bf16.mxu0 %v3253_v3  ;;  %2657 = vmatprep.subr.bf16.mxu1 %v3549_v5 }
 0x340   :  { %v827_v59 = vpop.f32.mrb[4].mxu0  ;;  %v898_v13 = vpop.f32.mrb[12].mxu1 }
 0x341   :  { %v907_v53 = vrot.slane %v827_v59, 4  ;;  %v909_v57 = vrot.slane %v898_v13, 4  ;;  %v829_v58 = vpop.f32.mrb[5].mxu0  ;;  %v900_v60 = vpop.f32.mrb[13].mxu1 }
 0x342   :  { %v908_v63 = vrot.slane %v829_v58, 4  ;;  %v910_v0 = vrot.slane %v900_v60, 4 }
 0x343   :  { %v915_v4 = vadd.f32 %v907_v53, %v3631_v10  ;;  %v917_v11 = vadd.f32 %v909_v57, %v3641_v22 }
 0x344   :  { %v916_v19 = vadd.f32 %v908_v63, %v3633_v12  ;;  %v918_v30 = vadd.f32 %v910_v0, %v3643_v26 }
 0x345   :  { %3004 = vtanh.f32 %v915_v4 }
 0x346   :  { %3006 = vtanh.f32 %v916_v19 }
 0x347   :  { %3008 = vtanh.f32 %v917_v11 }
 0x348   :  { %3010 = vtanh.f32 %v918_v30 }
 0x34f   :  { %v3005_v35 = vpop.eup %3004 }
 0x350   :  { %v923_v38 = vmul.f32 0.5, %v3005_v35  ;;  %v3007_v39 = vpop.eup %3006 }
 0x351   :  { %v925_v44 = vmul.f32 0.5, %v3007_v39  ;;  %v3009_v45 = vpop.eup %3008 }
 0x352   :  { %v924_v43 = vadd.f32 0.5, %v923_v38  ;;  %v3011_v58 = vpop.eup %3010 }
 0x353   :  { %v926_v50 = vadd.f32 0.5, %v925_v44  ;;  %v927_v63 = vmul.f32 0.5, %v3011_v58 }
 0x354   :  { %v933_v59 = vmul.f32 %v3009_v45, %v924_v43 }
 0x355   :  { %v932_v13 = vmul.f32 %v930_v46, %v926_v50  ;;  %v928_v0 = vadd.f32 0.5, %v927_v63 }
 0x357   :  { %v934_v53 = vadd.f32 %v933_v59, %v932_v13 }
 0x359   :  { %3012 = vtanh.f32 %v934_v53  ;;  %v943_v57 = vrot.slane %v934_v53, 4 }
 0x35b   :  { %v3747_v60 = vsel %vm937_vm4, %v943_v57, %v3699_v40 }
 0x363   :  { %v3013_v4 = vpop.eup %3012 }
 0x364   :  { %v936_v11 = vmul.f32 %v3013_v4, %v928_v0 }
 0x366   :  { %v939_v19 = vrot.slane %v936_v11, 4  ;;  %v1115_v11 = vrot.slane %v3747_v60, 2 }
 0x368   :  { %v3750_v30 = vsel %vm937_vm4, %v939_v19, %v3702_v52 }
 0x369   :  { %1011 = vmatmul.mubr.f32.vlgmr.msra.gmra.mrb[6].mxu0 %v3750_v30  ;;  %1082 = vmatmul.mubr.f32.vlgmr.msra.gmra.mrb[14].mxu1 %v3750_v30 }
 0x36a   :  { %2627 = vmatpush1.bf16.msra.mxu0 %v3259_v8  ;;  %2659 = vmatpush1.bf16.msra.mxu1 %v3553_v17 }
 0x36b   :  { %2629 = vmatprep.subr.bf16.mxu0 %v3261_v9  ;;  %2661 = vmatprep.subr.bf16.mxu1 %v3557_v18 }
 0x36c   :  { %1195 = vmatprep.mubr.f32.mxu0 %v3174_v7  ;;  %1266 = vmatprep.mubr.f32.mxu1 %v3174_v7 }
 0x36e   :  { %2631 = vmatpush1.bf16.msra.mxu0 %v3281_v16  ;;  %2663 = vmatpush1.bf16.msra.mxu1 %v3562_v24 }
 0x36f   :  { %2633 = vmatprep.subr.bf16.mxu0 %v3286_v23  ;;  %2665 = vmatprep.subr.bf16.mxu1 %v3566_v25 }
 0x372   :  { %2635 = vmatpush1.bf16.msra.mxu0 %v3315_v33  ;;  %2667 = vmatpush1.bf16.msra.mxu1 %v3572_v32 }
 0x373   :  { %2637 = vmatprep.subr.bf16.mxu0 %v3333_v37  ;;  %2669 = vmatprep.subr.bf16.mxu1 %v3576_v34 }
 0x376   :  { %2639 = vmatpush1.bf16.msra.mxu0 %v3363_v49  ;;  %2671 = vmatpush1.bf16.msra.mxu1 %v3581_v41 }
 0x377   :  { %2641 = vmatprep.subr.bf16.mxu0 %v3378_v54  ;;  %2673 = vmatprep.subr.bf16.mxu1 %v3585_v42 }
 0x37a   :  { %2643 = vmatpush1.bf16.msra.mxu0 %v3421_v1  ;;  %2675 = vmatpush1.bf16.msra.mxu1 %v3589_v47 }
 0x37b   :  { %2645 = vmatprep.subr.bf16.mxu0 %v3427_v6  ;;  %2677 = vmatprep.subr.bf16.mxu1 %v3593_v48 }
 0x37e   :  { %2647 = vmatpush1.bf16.msra.mxu0 %v3444_v14  ;;  %2679 = vmatpush1.bf16.msra.mxu1 %v3596_v55 }
 0x37f   :  { %2649 = vmatprep.subr.bf16.mxu0 %v3455_v15  ;;  %2681 = vmatprep.subr.bf16.mxu1 %v3599_v56 }
 0x382   :  { %2651 = vmatpush1.bf16.msra.mxu0 %v3471_v28  ;;  %2683 = vmatpush1.bf16.msra.mxu1 %v3602_v61 }
 0x383   :  { %2653 = vmatprep.subr.bf16.mxu0 %v3481_v31  ;;  %2685 = vmatprep.subr.bf16.mxu1 %v3605_v62 }
 0x386   :  { %2655 = vmatpush1.bf16.msra.mxu0 %v3488_v36  ;;  %2687 = vmatpush1.bf16.msra.mxu1 %v3608_v2 }
 0x387   :  { %2689 = vmatprep.subr.bf16.mxu0 %v3253_v3  ;;  %2721 = vmatprep.subr.bf16.mxu1 %v3549_v5 }
 0x43c   :  { %v1012_v40 = vpop.f32.mrb[6].mxu0  ;;  %v1083_v52 = vpop.f32.mrb[14].mxu1 }
 0x43d   :  { %v1092_v35 = vrot.slane %v1012_v40, 2  ;;  %v1094_v38 = vrot.slane %v1083_v52, 2  ;;  %v1014_v39 = vpop.f32.mrb[7].mxu0  ;;  %v1085_v43 = vpop.f32.mrb[15].mxu1 }
 0x43e   :  { %v1093_v44 = vrot.slane %v1014_v39, 2  ;;  %v1095_v45 = vrot.slane %v1085_v43, 2 }
 0x43f   :  { %v1100_v46 = vadd.f32 %v1092_v35, %v3631_v10  ;;  %v1102_v50 = vadd.f32 %v1094_v38, %v3641_v22 }
 0x440   :  { %v1101_v59 = vadd.f32 %v1093_v44, %v3633_v12  ;;  %v1103_v13 = vadd.f32 %v1095_v45, %v3643_v26 }
 0x441   :  { %3014 = vtanh.f32 %v1100_v46 }
 0x442   :  { %3016 = vtanh.f32 %v1101_v59 }
 0x443   :  { %3018 = vtanh.f32 %v1102_v50 }
 0x444   :  { %3020 = vtanh.f32 %v1103_v13 }
 0x44b   :  { %v3015_v53 = vpop.eup %3014 }
 0x44c   :  { %v1108_v57 = vmul.f32 0.5, %v3015_v53  ;;  %v3017_v58 = vpop.eup %3016 }
 0x44d   :  { %v1110_v0 = vmul.f32 0.5, %v3017_v58  ;;  %v3019_v4 = vpop.eup %3018 }
 0x44e   :  { %v1109_v63 = vadd.f32 0.5, %v1108_v57  ;;  %v3021_v26 = vpop.eup %3020 }
 0x44f   :  { %v1111_v19 = vadd.f32 0.5, %v1110_v0  ;;  %v1112_v35 = vmul.f32 0.5, %v3021_v26 }
 0x450   :  { %v1118_v10 = vmul.f32 %v3019_v4, %v1109_v63 }
 0x451   :  { %v1117_v40 = vmul.f32 %v1115_v11, %v1111_v19  ;;  %v1113_v38 = vadd.f32 0.5, %v1112_v35 }
 0x453   :  { %v1119_v22 = vadd.f32 %v1118_v10, %v1117_v40 }
 0x455   :  { %3022 = vtanh.f32 %v1119_v22  ;;  %v1128_v12 = vrot.slane %v1119_v22, 6 }
 0x457   :  { %v3795_v52 = vsel %vm1122_vm5, %v1128_v12, %v3747_v60 }
 0x45f   :  { %v3023_v39 = vpop.eup %3022 }
 0x460   :  { %v1121_v43 = vmul.f32 %v3023_v39, %v1113_v38 }
 0x462   :  { %v1124_v44 = vrot.slane %v1121_v43, 6 }
 0x464   :  { %v3798_v45 = vsel %vm1122_vm5, %v1124_v44, %v3750_v30 }
 0x465   :  { %1196 = vmatmul.mubr.f32.vlgmr.msra.gmra.mrb[8].mxu0 %v3798_v45  ;;  %1267 = vmatmul.mubr.f32.vlgmr.msra.gmra.mrb[16].mxu1 %v3798_v45 }
 0x466   :  { %2691 = vmatpush1.bf16.msra.mxu0 %v3259_v8  ;;  %2723 = vmatpush1.bf16.msra.mxu1 %v3553_v17 }
 0x467   :  { %2693 = vmatprep.subr.bf16.mxu0 %v3261_v9  ;;  %2725 = vmatprep.subr.bf16.mxu1 %v3557_v18 }
 0x468   :  { %1359 = vmatprep.mubr.f32.mxu0 %v3174_v7  ;;  %1430 = vmatprep.mubr.f32.mxu1 %v3174_v7 }
 0x46a   :  { %2695 = vmatpush1.bf16.msra.mxu0 %v3281_v16  ;;  %2727 = vmatpush1.bf16.msra.mxu1 %v3562_v24 }
 0x46b   :  { %2697 = vmatprep.subr.bf16.mxu0 %v3286_v23  ;;  %2729 = vmatprep.subr.bf16.mxu1 %v3566_v25 }
 0x46e   :  { %2699 = vmatpush1.bf16.msra.mxu0 %v3315_v33  ;;  %2731 = vmatpush1.bf16.msra.mxu1 %v3572_v32 }
 0x46f   :  { %2701 = vmatprep.subr.bf16.mxu0 %v3333_v37  ;;  %2733 = vmatprep.subr.bf16.mxu1 %v3576_v34 }
 0x472   :  { %2703 = vmatpush1.bf16.msra.mxu0 %v3363_v49  ;;  %2735 = vmatpush1.bf16.msra.mxu1 %v3581_v41 }
 0x473   :  { %2705 = vmatprep.subr.bf16.mxu0 %v3378_v54  ;;  %2737 = vmatprep.subr.bf16.mxu1 %v3585_v42 }
 0x476   :  { %2707 = vmatpush1.bf16.msra.mxu0 %v3421_v1  ;;  %2739 = vmatpush1.bf16.msra.mxu1 %v3589_v47 }
 0x477   :  { %2709 = vmatprep.subr.bf16.mxu0 %v3427_v6  ;;  %2741 = vmatprep.subr.bf16.mxu1 %v3593_v48 }
 0x47a   :  { %2711 = vmatpush1.bf16.msra.mxu0 %v3444_v14  ;;  %2743 = vmatpush1.bf16.msra.mxu1 %v3596_v55 }
 0x47b   :  { %2713 = vmatprep.subr.bf16.mxu0 %v3455_v15  ;;  %2745 = vmatprep.subr.bf16.mxu1 %v3599_v56 }
 0x47e   :  { %2715 = vmatpush1.bf16.msra.mxu0 %v3471_v28  ;;  %2747 = vmatpush1.bf16.msra.mxu1 %v3602_v61 }
 0x47f   :  { %2717 = vmatprep.subr.bf16.mxu0 %v3481_v31  ;;  %2749 = vmatprep.subr.bf16.mxu1 %v3605_v62 }
 0x482   :  { %2719 = vmatpush1.bf16.msra.mxu0 %v3488_v36  ;;  %2751 = vmatpush1.bf16.msra.mxu1 %v3608_v2 }
 0x483   :  { %2753 = vmatprep.subr.bf16.mxu0 %v3253_v3  ;;  %2785 = vmatprep.subr.bf16.mxu1 %v3549_v5 }
 0x538   :  { %v1197_v60 = vpop.f32.mrb[8].mxu0  ;;  %v1268_v30 = vpop.f32.mrb[16].mxu1 }
 0x539   :  { %v1273_v46 = vadd.f32 %v1197_v60, %v3637_v20  ;;  %v1275_v50 = vadd.f32 %v1268_v30, %v3645_v27  ;;  %v1199_v59 = vpop.f32.mrb[9].mxu0  ;;  %v1270_v13 = vpop.f32.mrb[17].mxu1 }
 0x53a   :  { %v1274_v53 = vadd.f32 %v1199_v59, %v3639_v21  ;;  %v1276_v57 = vadd.f32 %v1270_v13, %v3647_v29 }
 0x53b   :  { %3024 = vtanh.f32 %v1273_v46 }
 0x53c   :  { %3026 = vtanh.f32 %v1274_v53 }
 0x53d   :  { %3028 = vtanh.f32 %v1275_v50 }
 0x53e   :  { %3030 = vtanh.f32 %v1276_v57 }
 0x545   :  { %v3025_v58 = vpop.eup %3024 }
 0x546   :  { %v1281_v63 = vmul.f32 0.5, %v3025_v58  ;;  %v3027_v0 = vpop.eup %3026 }
 0x547   :  { %v1283_v11 = vmul.f32 0.5, %v3027_v0  ;;  %v3029_v19 = vpop.eup %3028 }
 0x548   :  { %v1282_v4 = vadd.f32 0.5, %v1281_v63  ;;  %v3031_v35 = vpop.eup %3030 }
 0x549   :  { %v1284_v10 = vadd.f32 0.5, %v1283_v11  ;;  %v1285_v38 = vmul.f32 0.5, %v3031_v35 }
 0x54a   :  { %v1288_v40 = vmul.f32 %v3029_v19, %v1282_v4 }
 0x54b   :  { %v1287_v22 = vmul.f32 %v1284_v10, %v3795_v52  ;;  %v1286_v39 = vadd.f32 0.5, %v1285_v38 }
 0x54d   :  { %v1289_v12 = vadd.f32 %v1288_v40, %v1287_v22 }
 0x54f   :  { %3032 = vtanh.f32 %v1289_v12  ;;  %v3843_v26 = vsel %vm1292_vm6, %v1289_v12, %v3795_v52 }
 0x550   :  { %v1464_v40 = vrot.slane %v3843_v26, 6 }
 0x559   :  { %v3033_v43 = vpop.eup %3032 }
 0x55a   :  { %v1291_v44 = vmul.f32 %v3033_v43, %v1286_v39 }
 0x55c   :  { %v3846_v60 = vsel %vm1292_vm6, %v1291_v44, %v3798_v45 }
 0x55d   :  { %1360 = vmatmul.mubr.f32.vlgmr.msra.gmra.mrb[10].mxu0 %v3846_v60  ;;  %1431 = vmatmul.mubr.f32.vlgmr.msra.gmra.mrb[18].mxu1 %v3846_v60 }
 0x55e   :  { %2755 = vmatpush1.bf16.msra.mxu0 %v3259_v8  ;;  %2787 = vmatpush1.bf16.msra.mxu1 %v3553_v17 }
 0x55f   :  { %2757 = vmatprep.subr.bf16.mxu0 %v3261_v9  ;;  %2789 = vmatprep.subr.bf16.mxu1 %v3557_v18 }
 0x560   :  { %1544 = vmatprep.mubr.f32.mxu0 %v3174_v7  ;;  %1615 = vmatprep.mubr.f32.mxu1 %v3174_v7 }
 0x562   :  { %2759 = vmatpush1.bf16.msra.mxu0 %v3281_v16  ;;  %2791 = vmatpush1.bf16.msra.mxu1 %v3562_v24 }
 0x563   :  { %2761 = vmatprep.subr.bf16.mxu0 %v3286_v23  ;;  %2793 = vmatprep.subr.bf16.mxu1 %v3566_v25 }
 0x566   :  { %2763 = vmatpush1.bf16.msra.mxu0 %v3315_v33  ;;  %2795 = vmatpush1.bf16.msra.mxu1 %v3572_v32 }
 0x567   :  { %2765 = vmatprep.subr.bf16.mxu0 %v3333_v37  ;;  %2797 = vmatprep.subr.bf16.mxu1 %v3576_v34 }
 0x56a   :  { %2767 = vmatpush1.bf16.msra.mxu0 %v3363_v49  ;;  %2799 = vmatpush1.bf16.msra.mxu1 %v3581_v41 }
 0x56b   :  { %2769 = vmatprep.subr.bf16.mxu0 %v3378_v54  ;;  %2801 = vmatprep.subr.bf16.mxu1 %v3585_v42 }
 0x56e   :  { %2771 = vmatpush1.bf16.msra.mxu0 %v3421_v1  ;;  %2803 = vmatpush1.bf16.msra.mxu1 %v3589_v47 }
 0x56f   :  { %2773 = vmatprep.subr.bf16.mxu0 %v3427_v6  ;;  %2805 = vmatprep.subr.bf16.mxu1 %v3593_v48 }
 0x572   :  { %2775 = vmatpush1.bf16.msra.mxu0 %v3444_v14  ;;  %2807 = vmatpush1.bf16.msra.mxu1 %v3596_v55 }
 0x573   :  { %2777 = vmatprep.subr.bf16.mxu0 %v3455_v15  ;;  %2809 = vmatprep.subr.bf16.mxu1 %v3599_v56 }
 0x576   :  { %2779 = vmatpush1.bf16.msra.mxu0 %v3471_v28  ;;  %2811 = vmatpush1.bf16.msra.mxu1 %v3602_v61 }
 0x577   :  { %2781 = vmatprep.subr.bf16.mxu0 %v3481_v31  ;;  %2813 = vmatprep.subr.bf16.mxu1 %v3605_v62 }
 0x57a   :  { %2783 = vmatpush1.bf16.msra.mxu0 %v3488_v36  ;;  %2815 = vmatpush1.bf16.msra.mxu1 %v3608_v2 }
 0x57b   :  { %2817 = vmatprep.subr.bf16.mxu0 %v3253_v3  ;;  %2849 = vmatprep.subr.bf16.mxu1 %v3549_v5 }
 0x630   :  { %v1361_v52 = vpop.f32.mrb[10].mxu0  ;;  %v1432_v45 = vpop.f32.mrb[18].mxu1 }
 0x631   :  { %v1441_v30 = vrot.slane %v1361_v52, 6  ;;  %v1443_v46 = vrot.slane %v1432_v45, 6  ;;  %v1363_v50 = vpop.f32.mrb[11].mxu0  ;;  %v1434_v59 = vpop.f32.mrb[19].mxu1 }
 0x632   :  { %v1442_v13 = vrot.slane %v1363_v50, 6  ;;  %v1444_v53 = vrot.slane %v1434_v59, 6 }
 0x633   :  { %v1449_v57 = vadd.f32 %v1441_v30, %v3637_v20  ;;  %v1451_v58 = vadd.f32 %v1443_v46, %v3645_v27 }
 0x634   :  { %v1450_v63 = vadd.f32 %v1442_v13, %v3639_v21  ;;  %v1452_v0 = vadd.f32 %v1444_v53, %v3647_v29 }
 0x635   :  { %3034 = vtanh.f32 %v1449_v57 }
 0x636   :  { %3036 = vtanh.f32 %v1450_v63 }
 0x637   :  { %3038 = vtanh.f32 %v1451_v58 }
 0x638   :  { %3040 = vtanh.f32 %v1452_v0 }
 0x63f   :  { %v3035_v3 = vpop.eup %3034 }
 0x640   :  { %v1457_v5 = vmul.f32 0.5, %v3035_v3  ;;  %v3037_v4 = vpop.eup %3036 }
 0x641   :  { %v1459_v19 = vmul.f32 0.5, %v3037_v4  ;;  %v3039_v10 = vpop.eup %3038 }
 0x642   :  { %v1458_v11 = vadd.f32 0.5, %v1457_v5  ;;  %v3041_v43 = vpop.eup %3040 }
 0x643   :  { %v1460_v22 = vadd.f32 0.5, %v1459_v19  ;;  %v1461_v52 = vmul.f32 0.5, %v3041_v43 }
 0x644   :  { %v1467_v12 = vmul.f32 %v3039_v10, %v1458_v11 }
 0x645   :  { %v1466_v35 = vmul.f32 %v1464_v40, %v1460_v22  ;;  %v1462_v45 = vadd.f32 0.5, %v1461_v52 }
 0x647   :  { %v1468_v38 = vadd.f32 %v1467_v12, %v1466_v35 }
 0x649   :  { %3042 = vtanh.f32 %v1468_v38  ;;  %v1477_v39 = vrot.slane %v1468_v38, 2 }
 0x64b   :  { %v3891_v44 = vsel %vm1471_vm7, %v1477_v39, %v3843_v26 }
 0x653   :  { %v3043_v30 = vpop.eup %3042 }
 0x654   :  { %v1470_v46 = vmul.f32 %v3043_v30, %v1462_v45 }
 0x656   :  { %v1473_v50 = vrot.slane %v1470_v46, 2 }
 0x658   :  { %v3894_v59 = vsel %vm1471_vm7, %v1473_v50, %v3846_v60 }
 0x659   :  { %1545 = vmatmul.mubr.f32.vlgmr.msra.gmra.mrb[12].mxu0 %v3894_v59  ;;  %1616 = vmatmul.mubr.f32.vlgmr.msra.gmra.mrb[20].mxu1 %v3894_v59 }
 0x65a   :  { %2819 = vmatpush1.bf16.msra.mxu0 %v3259_v8  ;;  %2851 = vmatpush1.bf16.msra.mxu1 %v3553_v17 }
 0x65b   :  { %2821 = vmatprep.subr.bf16.mxu0 %v3261_v9  ;;  %2853 = vmatprep.subr.bf16.mxu1 %v3557_v18 }
 0x65c   :  { %1729 = vmatprep.mubr.f32.mxu0 %v3174_v7  ;;  %1800 = vmatprep.mubr.f32.mxu1 %v3174_v7 }
 0x65e   :  { %2823 = vmatpush1.bf16.msra.mxu0 %v3281_v16  ;;  %2855 = vmatpush1.bf16.msra.mxu1 %v3562_v24 }
 0x65f   :  { %2825 = vmatprep.subr.bf16.mxu0 %v3286_v23  ;;  %2857 = vmatprep.subr.bf16.mxu1 %v3566_v25  ;;  %v1649_v25 = vrot.slane %v3891_v44, 4 }
 0x662   :  { %2827 = vmatpush1.bf16.msra.mxu0 %v3315_v33  ;;  %2859 = vmatpush1.bf16.msra.mxu1 %v3572_v32 }
 0x663   :  { %2829 = vmatprep.subr.bf16.mxu0 %v3333_v37  ;;  %2861 = vmatprep.subr.bf16.mxu1 %v3576_v34 }
 0x666   :  { %2831 = vmatpush1.bf16.msra.mxu0 %v3363_v49  ;;  %2863 = vmatpush1.bf16.msra.mxu1 %v3581_v41 }
 0x667   :  { %2833 = vmatprep.subr.bf16.mxu0 %v3378_v54  ;;  %2865 = vmatprep.subr.bf16.mxu1 %v3585_v42 }
 0x66a   :  { %2835 = vmatpush1.bf16.msra.mxu0 %v3421_v1  ;;  %2867 = vmatpush1.bf16.msra.mxu1 %v3589_v47 }
 0x66b   :  { %2837 = vmatprep.subr.bf16.mxu0 %v3427_v6  ;;  %2869 = vmatprep.subr.bf16.mxu1 %v3593_v48 }
 0x66e   :  { %2839 = vmatpush1.bf16.msra.mxu0 %v3444_v14  ;;  %2871 = vmatpush1.bf16.msra.mxu1 %v3596_v55 }
 0x66f   :  { %2841 = vmatprep.subr.bf16.mxu0 %v3455_v15  ;;  %2873 = vmatprep.subr.bf16.mxu1 %v3599_v56 }
 0x672   :  { %2843 = vmatpush1.bf16.msra.mxu0 %v3471_v28  ;;  %2875 = vmatpush1.bf16.msra.mxu1 %v3602_v61 }
 0x673   :  { %2845 = vmatprep.subr.bf16.mxu0 %v3481_v31  ;;  %2877 = vmatprep.subr.bf16.mxu1 %v3605_v62 }
 0x676   :  { %2847 = vmatpush1.bf16.msra.mxu0 %v3488_v36  ;;  %2879 = vmatpush1.bf16.msra.mxu1 %v3608_v2 }
 0x72c   :  { %v1546_v8 = vpop.f32.mrb[12].mxu0  ;;  %v1617_v9 = vpop.f32.mrb[20].mxu1 }
 0x72d   :  { %v1626_v16 = vrot.slane %v1546_v8, 4  ;;  %v1628_v23 = vrot.slane %v1617_v9, 4  ;;  %v1548_v33 = vpop.f32.mrb[13].mxu0  ;;  %v1619_v37 = vpop.f32.mrb[21].mxu1 }
 0x72e   :  { %v1627_v49 = vrot.slane %v1548_v33, 4  ;;  %v1629_v54 = vrot.slane %v1619_v37, 4 }
 0x72f   :  { %v1634_v1 = vadd.f32 %v1626_v16, %v3637_v20  ;;  %v1636_v6 = vadd.f32 %v1628_v23, %v3645_v27 }
 0x730   :  { %v1635_v14 = vadd.f32 %v1627_v49, %v3639_v21  ;;  %v1637_v15 = vadd.f32 %v1629_v54, %v3647_v29 }
 0x731   :  { %3044 = vtanh.f32 %v1634_v1 }
 0x732   :  { %3046 = vtanh.f32 %v1635_v14 }
 0x733   :  { %3048 = vtanh.f32 %v1636_v6 }
 0x734   :  { %3050 = vtanh.f32 %v1637_v15 }
 0x73b   :  { %v3045_v28 = vpop.eup %3044 }
 0x73c   :  { %v1642_v31 = vmul.f32 0.5, %v3045_v28  ;;  %v3047_v36 = vpop.eup %3046 }
 0x73d   :  { %v1644_v18 = vmul.f32 0.5, %v3047_v36  ;;  %v3049_v24 = vpop.eup %3048 }
 0x73e   :  { %v1643_v17 = vadd.f32 0.5, %v1642_v31  ;;  %v3051_v48 = vpop.eup %3050 }
 0x73f   :  { %v1645_v32 = vadd.f32 0.5, %v1644_v18  ;;  %v1646_v56 = vmul.f32 0.5, %v3051_v48 }
 0x740   :  { %v1652_v34 = vmul.f32 %v3049_v24, %v1643_v17 }
 0x741   :  { %v1651_v41 = vmul.f32 %v1649_v25, %v1645_v32  ;;  %v1647_v61 = vadd.f32 0.5, %v1646_v56 }
 0x743   :  { %v1653_v42 = vadd.f32 %v1652_v34, %v1651_v41 }
 0x745   :  { %3052 = vtanh.f32 %v1653_v42  ;;  %v1662_v47 = vrot.slane %v1653_v42, 4 }
 0x747   :  { %v3937_v55 = vsel %vm1656_vm8, %v1662_v47, %v3891_v44 }
 0x74f   :  { %v3053_v62 = vpop.eup %3052 }
 0x750   :  { %v1655_v2 = vmul.f32 %v3053_v62, %v1647_v61 }
 0x752   :  { %v1658_v29 = vrot.slane %v1655_v2, 4 }
 0x754   :  { %v1660_v26 = vsel %vm1656_vm8, %v1658_v29, %v3894_v59 }
 0x755   :  { %1730 = vmatmul.mubr.f32.vlgmr.msra.gmra.mrb[14].mxu0 %v1660_v26  ;;  %1801 = vmatmul.mubr.f32.vlgmr.msra.gmra.mrb[22].mxu1 %v1660_v26 }
 0x756   :  { %3103 = shalt.err (!%p3100_p1)  }
 0x757   :  { %s3104_s18 = scalar_lea.vmem %s67_s12, 6144  ;;  %p3109_p3 = scmp.lt.s32.totalorder %s67_s12, %s67_s12 }
 0x758   :  { %p3105_p2 = scmp.ne.s32.totalorder %s67_s12, %s3104_s18  ;;  %p3110_p4 = scmp.lt.s32.totalorder %s3104_s18, %s3104_s18 }
 0x75a   :  { %p3111_p5 = por %p3110_p4, %p3109_p3 }
 0x75c   :  { %p3112_p6 = pnand %p3111_p5, %p3105_p2 }
 0x75e   :  { %3115 = shalt.err (!%p3112_p6)  }
 0x75f   :  { %69 = dma.hbm_to_vmem [thread:$0]  %s4010_s6, 6144, %s67_s12, [#allocation5] }
 0x760   :  { %s4027_s13 = sld [smem:[#allocation25_spill]] }
 0x766   :  { %s3116_s25 = scalar_lea.hbm %s4027_s13, 4096 }
 0x767   :  { %p3117_p7 = scmp.ne.s32.totalorder %s4027_s13, %s3116_s25  ;;  %p3120_p8 = scmp.lt.u32.totalorder %s3116_s25, %s4027_s13 }
 0x769   :  { %p3122_p9 = pnand %p3120_p8, %p3117_p7 }
 0x76b   :  { %3125 = shalt.err (!%p3122_p9)  }
 0x76c   :  { %s3126_s19 = scalar_lea.vmem %s79_s14, 4096  ;;  %p3131_p11 = scmp.lt.s32.totalorder %s79_s14, %s79_s14 }
 0x76d   :  { %p3127_p10 = scmp.ne.s32.totalorder %s79_s14, %s3126_s19  ;;  %p3132_p12 = scmp.lt.s32.totalorder %s3126_s19, %s3126_s19 }
 0x76f   :  { %p3133_p13 = por %p3132_p12, %p3131_p11 }
 0x771   :  { %p3134_p0 = pnand %p3133_p13, %p3127_p10 }
 0x773   :  { %3137 = shalt.err (!%p3134_p0)  }
 0x774   :  { %81 = dma.hbm_to_vmem [thread:$0]  %s4027_s13, 4096, %s79_s14, [#allocation5 + $0x1]  ;;  %v1826_v35 = vrot.slane %v3937_v55, 2  ;;  %vm1831_vm9 = vcmp.gt.s32.totalorder %v3651_v51, 7 }
 0x828   :  { %v1731_v60 = vpop.f32.mrb[14].mxu0  ;;  %v1802_v13 = vpop.f32.mrb[22].mxu1 }
 0x829   :  { %v1809_v53 = vrot.slane %v1731_v60, 2  ;;  %v1811_v57 = vrot.slane %v1802_v13, 2  ;;  %v1733_v58 = vpop.f32.mrb[15].mxu0  ;;  %v1804_v63 = vpop.f32.mrb[23].mxu1 }
 0x82a   :  { %v1810_v0 = vrot.slane %v1733_v58, 2 }
 0x82b   :  { %v1815_v3 = vadd.f32 %v1809_v53, %v3637_v20  ;;  %v1817_v5 = vadd.f32 %v1811_v57, %v3645_v27 }
 0x82c   :  { %v1816_v4 = vadd.f32 %v1810_v0, %v3639_v21 }
 0x82d   :  { %3054 = vtanh.f32 %v1815_v3 }
 0x82e   :  { %3056 = vtanh.f32 %v1816_v4 }
 0x82f   :  { %3058 = vtanh.f32 %v1817_v5 }
 0x837   :  { %v3055_v11 = vpop.eup %3054 }
 0x838   :  { %v1821_v19 = vmul.f32 0.5, %v3055_v11  ;;  %v3057_v10 = vpop.eup %3056 }
 0x839   :  { %v1823_v22 = vmul.f32 0.5, %v3057_v10  ;;  %v3059_v12 = vpop.eup %3058 }
 0x83a   :  { %v1822_v40 = vadd.f32 0.5, %v1821_v19 }
 0x83b   :  { %v1824_v38 = vadd.f32 0.5, %v1823_v22 }
 0x83c   :  { %v1829_v39 = vmul.f32 %v3059_v12, %v1822_v40 }
 0x83d   :  { %v1828_v43 = vmul.f32 %v1826_v35, %v1824_v38 }
 0x83f   :  { %v1830_v44 = vadd.f32 %v1829_v39, %v1828_v43 }
 0x841   :  { %v1833_v20 = vrot.slane %v1830_v44, 6 }
 0x843   :  { %v3970_v21 = vsel %vm1831_vm9, %v1833_v20, %v3937_v55 }
 0x844   :  { %3164 = dma.done.wait [#allocation5], 6144 }
 0x845   :  { %3165 = vsyncadd [#allocation5], 4294961152 }
 0x846   :  { %3166 = dma.done.wait [#allocation5 + $0x1], 4096 }
 0x847   :  { %3167 = vsyncadd [#allocation5 + $0x1], 4294963200  ;;  %v3178_v27 = vmov 0.0|0.0   ;;  %vm3179_vm10 = vmmov 0   ;;  %v1871_v52 = vld [vmem:[#allocation3 + $0x80] sm:$0xff]  ;;  %v1872_v45 = vld [vmem:[#allocation3 + $0x88] sm:$0xff] }
 0x848   :  { %2912 = vmatprep.subr.bf16.mxu1 %v3178_v27  ;;  %2333 = vmatprep.mubr.msk.f32.mxu1 %vm3179_vm10, %v3174_v7  ;;  %v1855_v30 = vld [vmem:[#allocation3] sm:$0xff]  ;;  %v2880_v46 = vpack.c.bf16 %v1872_v45, %v1871_v52  ;;  %v1856_v50 = vld [vmem:[#allocation3 + $0x8] sm:$0xff]  ;;  %v1873_v59 = vld [vmem:[#allocation3 + $0x90] sm:$0xff]  ;;  %s4028_s1 = sld [smem:[#allocation23_spill]]  ;;  %s4029_s3 = sld [smem:[#allocation24_spill]] }
 0x849   :  { %v1874_v51 = vld [vmem:[#allocation3 + $0x98] sm:$0xff]  ;;  %v2882_v8 = vpack.c.bf16 %v1856_v50, %v1855_v30  ;;  %v1857_v16 = vld [vmem:[#allocation3 + $0x10] sm:$0xff]  ;;  %v1887_v33 = vld [vmem:[#allocation3 + $0x100] sm:$0xff]  ;;  %s4030_s8 = sld [smem:[#allocation26_spill]]  ;;  %s3180_s14 = smov [#allocation11]  }
 0x84a   :  { %v2884_v9 = vpack.c.bf16 %v1874_v51, %v1873_v59  ;;  %v1858_v23 = vld [vmem:[#allocation3 + $0x18] sm:$0xff]  ;;  %2881 = vmatprep.subr.bf16.mxu0 %v2880_v46  ;;  %v1888_v37 = vld [vmem:[#allocation3 + $0x108] sm:$0xff]  ;;  %v1875_v49 = vld [vmem:[#allocation3 + $0xa0] sm:$0xff]  ;;  %s2184_s21 = sshll.u32 %s3180_s14, 4  ;;  %s2185_s21 = int_to_ptr.vmem [resolvable:$true] %s2184_s21 }
 0x84b   :  { %v1876_v54 = vld [vmem:[#allocation3 + $0xa8] sm:$0xff]  ;;  %2883 = vmatpush3.bf16.msra.mxu0 %v2882_v8  ;;  %v2886_v1 = vpack.c.bf16 %v1858_v23, %v1857_v16  ;;  %v2913_v6 = vpack.c.bf16 %v1888_v37, %v1887_v33  ;;  %v1889_v14 = vld [vmem:[#allocation3 + $0x110] sm:$0xff]  ;;  %v1859_v28 = vld [vmem:[#allocation3 + $0x20] sm:$0xff]  ;;  %s3138_s22 = scalar_lea.vmem %s2185_s21, 64  ;;  %p3143_p2 = scmp.lt.s32.totalorder %s2185_s21, %s2185_s21 }
 0x84c   :  { %2885 = vmatprep.subr.bf16.mxu0 %v2884_v9  ;;  %v2888_v15 = vpack.c.bf16 %v1876_v54, %v1875_v49  ;;  %v1860_v31 = vld [vmem:[#allocation3 + $0x28] sm:$0xff]  ;;  %v1890_v36 = vld [vmem:[#allocation3 + $0x118] sm:$0xff]  ;;  %v1877_v18 = vld [vmem:[#allocation3 + $0xb0] sm:$0xff]  ;;  %p3139_p1 = scmp.ne.s32.totalorder %s2185_s21, %s3138_s22  ;;  %p3144_p3 = scmp.lt.s32.totalorder %s3138_s22, %s3138_s22 }
 0x84d   :  { %2914 = vmatpush3.bf16.msra.mxu1 %v2913_v6  ;;  %v2916_v17 = vpack.c.bf16 %v1890_v36, %v1889_v14  ;;  %v1878_v24 = vld [vmem:[#allocation3 + $0xb8] sm:$0xff]  ;;  %v1891_v25 = vld [vmem:[#allocation3 + $0x120] sm:$0xff]  ;;  %v1892_v32 = vld [vmem:[#allocation3 + $0x128] sm:$0xff]  ;;  %v2890_v34 = vpack.c.bf16 %v1860_v31, %v1859_v28 }
 0x84e   :  { %2915 = vmatprep.subr.bf16.mxu1 %v3178_v27  ;;  %v2892_v41 = vpack.c.bf16 %v1878_v24, %v1877_v18  ;;  %v1861_v42 = vld [vmem:[#allocation3 + $0x30] sm:$0xff]  ;;  %v1862_v47 = vld [vmem:[#allocation3 + $0x38] sm:$0xff]  ;;  %v2919_v48 = vpack.c.bf16 %v1892_v32, %v1891_v25  ;;  %v1879_v55 = vld [vmem:[#allocation3 + $0xc0] sm:$0xff]  ;;  %p3145_p4 = por %p3144_p3, %p3143_p2 }
 0x84f   :  { %2887 = vmatpush3.bf16.msra.mxu0 %v2886_v1  ;;  %v1880_v56 = vld [vmem:[#allocation3 + $0xc8] sm:$0xff]  ;;  %v1893_v61 = vld [vmem:[#allocation3 + $0x130] sm:$0xff]  ;;  %v1894_v62 = vld [vmem:[#allocation3 + $0x138] sm:$0xff]  ;;  %v2894_v2 = vpack.c.bf16 %v1862_v47, %v1861_v42 }
 0x850   :  { %2889 = vmatprep.subr.bf16.mxu0 %v2888_v15  ;;  %v2896_v29 = vpack.c.bf16 %v1880_v56, %v1879_v55  ;;  %v1863_v26 = vld [vmem:[#allocation3 + $0x40] sm:$0xff]  ;;  %v1864_v60 = vld [vmem:[#allocation3 + $0x48] sm:$0xff]  ;;  %v2922_v13 = vpack.c.bf16 %v1894_v62, %v1893_v61  ;;  %v1881_v53 = vld [vmem:[#allocation3 + $0xd0] sm:$0xff]  ;;  %p3146_p5 = pnand %p3145_p4, %p3139_p1 }
 0x851   :  { %2917 = vmatpush3.bf16.msra.mxu1 %v2916_v17  ;;  %v1882_v57 = vld [vmem:[#allocation3 + $0xd8] sm:$0xff]  ;;  %v1895_v58 = vld [vmem:[#allocation3 + $0x140] sm:$0xff]  ;;  %v1896_v63 = vld [vmem:[#allocation3 + $0x148] sm:$0xff]  ;;  %v2898_v3 = vpack.c.bf16 %v1864_v60, %v1863_v26 }
 0x852   :  { %2918 = vmatprep.subr.bf16.mxu1 %v3178_v27  ;;  %v2244_v0 = vld.sshfl [vmem:[%s4028_s1] sm:$0x33 pattern:$0x76325410]  ;;  %v2900_v4 = vpack.c.bf16 %v1882_v57, %v1881_v53  ;;  %v1866_v19 = vld [vmem:[#allocation3 + $0x58] sm:$0xff]  ;;  %v2925_v10 = vpack.c.bf16 %v1896_v63, %v1895_v58  ;;  %v1883_v40 = vld [vmem:[#allocation3 + $0xe0] sm:$0xff] }
 0x853   :  { %2891 = vmatpush3.bf16.msra.mxu0 %v2890_v34  ;;  %v1852_v5 = vcombine.high %v2244_v0, %v2244_v0  ;;  %v1865_v11 = vld [vmem:[#allocation3 + $0x50] sm:$0xff]  ;;  %v1884_v22 = vld [vmem:[#allocation3 + $0xe8] sm:$0xff]  ;;  %v1898_v35 = vld [vmem:[#allocation3 + $0x158] sm:$0xff] }
 0x854   :  { %2893 = vmatprep.subr.bf16.mxu0 %v2892_v41  ;;  %v1897_v12 = vld [vmem:[#allocation3 + $0x150] sm:$0xff]  ;;  %v2902_v38 = vpack.c.bf16 %v1866_v19, %v1865_v11  ;;  %v2904_v39 = vpack.c.bf16 %v1884_v22, %v1883_v40  ;;  %v1867_v43 = vld [vmem:[#allocation3 + $0x60] sm:$0xff]  ;;  %v1868_v44 = vld [vmem:[#allocation3 + $0x68] sm:$0xff] }
 0x855   :  { %2920 = vmatpush3.bf16.msra.mxu1 %v2919_v48  ;;  %1974 = vmatprep.mubr.f32.mxu0 %v1852_v5  ;;  %v2928_v20 = vpack.c.bf16 %v1898_v35, %v1897_v12  ;;  %v1885_v52 = vld [vmem:[#allocation3 + $0xf0] sm:$0xff]  ;;  %v1886_v45 = vld [vmem:[#allocation3 + $0xf8] sm:$0xff]  ;;  %v1899_v30 = vld [vmem:[#allocation3 + $0x160] sm:$0xff]  ;;  %v2906_v50 = vpack.c.bf16 %v1868_v44, %v1867_v43 }
 0x856   :  { %2921 = vmatprep.subr.bf16.mxu1 %v3178_v27  ;;  %v1900_v46 = vld [vmem:[#allocation3 + $0x168] sm:$0xff]  ;;  %v2908_v59 = vpack.c.bf16 %v1886_v45, %v1885_v52  ;;  %v1869_v51 = vld [vmem:[#allocation3 + $0x70] sm:$0xff]  ;;  %v1870_v8 = vld [vmem:[#allocation3 + $0x78] sm:$0xff] }
 0x857   :  { %2895 = vmatpush3.bf16.msra.mxu0 %v2894_v2  ;;  %v2931_v9 = vpack.c.bf16 %v1900_v46, %v1899_v30  ;;  %v2052_v16 = vld [vmem:[#allocation4 + $0x8] sm:$0xff]  ;;  %v2054_v23 = vld [vmem:[#allocation4 + $0x18] sm:$0xff]  ;;  %v1901_v33 = vld [vmem:[#allocation3 + $0x170] sm:$0xff]  ;;  %v2910_v49 = vpack.c.bf16 %v1870_v8, %v1869_v51  ;;  %v2085_v51 = vlaneseq }
 0x858   :  { %2897 = vmatprep.subr.bf16.mxu0 %v2896_v29  ;;  %v1902_v37 = vld [vmem:[#allocation3 + $0x178] sm:$0xff]  ;;  %v2936_v54 = vpack.c.bf16 %v2054_v23, %v2052_v16  ;;  %v2051_v1 = vld [vmem:[#allocation4] sm:$0xff]  ;;  %v2053_v6 = vld [vmem:[#allocation4 + $0x10] sm:$0xff] }
 0x859   :  { %2923 = vmatpush3.bf16.msra.mxu1 %v2922_v13  ;;  %v2934_v14 = vpack.c.bf16 %v1902_v37, %v1901_v33  ;;  %v2056_v15 = vld [vmem:[#allocation4 + $0x28] sm:$0xff]  ;;  %v2058_v28 = vld [vmem:[#allocation4 + $0x38] sm:$0xff]  ;;  %v2938_v31 = vpack.c.bf16 %v2053_v6, %v2051_v1  ;;  %v2055_v17 = vld [vmem:[#allocation4 + $0x20] sm:$0xff]  ;;  %v2086_v8 = vshrl.u32 %v2085_v51, 7 }
 0x85a   :  { %2924 = vmatprep.subr.bf16.mxu1 %v3178_v27  ;;  %v2940_v36 = vpack.c.bf16 %v2058_v28, %v2056_v15  ;;  %v2057_v18 = vld [vmem:[#allocation4 + $0x30] sm:$0xff]  ;;  %v2060_v24 = vld [vmem:[#allocation4 + $0x48] sm:$0xff]  ;;  %v2062_v25 = vld [vmem:[#allocation4 + $0x58] sm:$0xff] }
 0x85b   :  { %2899 = vmatpush3.bf16.msra.mxu0 %v2898_v3  ;;  %v2942_v32 = vpack.c.bf16 %v2057_v18, %v2055_v17  ;;  %v2944_v34 = vpack.c.bf16 %v2062_v25, %v2060_v24  ;;  %v2059_v41 = vld [vmem:[#allocation4 + $0x40] sm:$0xff]  ;;  %v2064_v42 = vld [vmem:[#allocation4 + $0x68] sm:$0xff]  ;;  %v2066_v47 = vld [vmem:[#allocation4 + $0x78] sm:$0xff]  ;;  %v2091_v23 = vsub.s32 1, %v2086_v8 }
 0x85c   :  { %2901 = vmatprep.subr.bf16.mxu0 %v2900_v4  ;;  %v2948_v55 = vpack.c.bf16 %v2066_v47, %v2064_v42  ;;  %v2063_v56 = vld [vmem:[#allocation4 + $0x60] sm:$0xff]  ;;  %v2065_v61 = vld [vmem:[#allocation4 + $0x70] sm:$0xff]  ;;  %v2068_v62 = vld [vmem:[#allocation4 + $0x88] sm:$0xff] }
 0x85d   :  { %2926 = vmatpush3.bf16.msra.mxu1 %v2925_v10  ;;  %v2070_v2 = vld [vmem:[#allocation4 + $0x98] sm:$0xff]  ;;  %v2950_v29 = vpack.c.bf16 %v2065_v61, %v2063_v56  ;;  %v2067_v26 = vld [vmem:[#allocation4 + $0x80] sm:$0xff]  ;;  %v2072_v60 = vld [vmem:[#allocation4 + $0xa8] sm:$0xff] }
 0x85e   :  { %2927 = vmatprep.subr.bf16.mxu1 %v3178_v27  ;;  %v2074_v13 = vld [vmem:[#allocation4 + $0xb8] sm:$0xff]  ;;  %v2071_v58 = vld [vmem:[#allocation4 + $0xa0] sm:$0xff]  ;;  %v2073_v63 = vld [vmem:[#allocation4 + $0xb0] sm:$0xff] }
 0x85f   :  { %2903 = vmatpush3.bf16.msra.mxu0 %v2902_v38  ;;  %v2956_v57 = vpack.c.bf16 %v2074_v13, %v2072_v60  ;;  %v2076_v3 = vld [vmem:[#allocation4 + $0xc8] sm:$0xff]  ;;  %v2078_v5 = vld [vmem:[#allocation4 + $0xd8] sm:$0xff]  ;;  %v2075_v11 = vld [vmem:[#allocation4 + $0xc0] sm:$0xff] }
 0x860   :  { %2905 = vmatprep.subr.bf16.mxu0 %v2904_v39  ;;  %v2960_v4 = vpack.c.bf16 %v2078_v5, %v2076_v3  ;;  %v2077_v19 = vld [vmem:[#allocation4 + $0xd0] sm:$0xff]  ;;  %v2080_v40 = vld [vmem:[#allocation4 + $0xe8] sm:$0xff]  ;;  %v2082_v22 = vld [vmem:[#allocation4 + $0xf8] sm:$0xff] }
 0x861   :  { %2929 = vmatpush3.bf16.msra.mxu1 %v2928_v20  ;;  %v2962_v10 = vpack.c.bf16 %v2077_v19, %v2075_v11  ;;  %v2964_v12 = vpack.c.bf16 %v2082_v22, %v2080_v40  ;;  %v2079_v35 = vld [vmem:[#allocation4 + $0xe0] sm:$0xff]  ;;  %v2081_v38 = vld [vmem:[#allocation4 + $0xf0] sm:$0xff] }
 0x862   :  { %2930 = vmatprep.subr.bf16.mxu1 %v3178_v27  ;;  %v2966_v39 = vpack.c.bf16 %v2081_v38, %v2079_v35  ;;  %v2245_v20 = vld [vmem:[%s4029_s3] ss:$0 sm:$0xff] }
 0x863   :  { %2907 = vmatpush3.bf16.msra.mxu0 %v2906_v50  ;;  %v2083_v16 = vld [vmem:[%s4030_s8] sm:$0x3] }
 0x864   :  { %2909 = vmatprep.subr.bf16.mxu0 %v2908_v59  ;;  %v2092_v37 = vrot.slane %v2083_v16, %v2091_v23 }
 0x865   :  { %2932 = vmatpush3.bf16.msra.mxu1 %v2931_v9  ;;  %v2087_v9 = vsub.s32 0, %v2086_v8 }
 0x866   :  { %2933 = vmatprep.subr.bf16.mxu1 %v3178_v27  ;;  %v2061_v27 = vld [vmem:[#allocation4 + $0x50] sm:$0xff] }
 0x867   :  { %2911 = vmatpush3.bf16.msra.mxu0 %v2910_v49  ;;  %v2946_v48 = vpack.c.bf16 %v2061_v27, %v2059_v41  ;;  %v2088_v33 = vrot.slane %v2083_v16, %v2087_v9 }
 0x868   :  { %2937 = vmatprep.subr.bf16.mxu0 %v2936_v54 }
 0x869   :  { %2935 = vmatpush3.bf16.msra.mxu1 %v2934_v14 }
 0x86a   :  { %1975 = vmatmul.mubr.f32.vlgmr.msra.gmra.mrb[16].mxu0 %v2244_v0  ;;  %v2958_v0 = vpack.c.bf16 %v2073_v63, %v2071_v58 }
 0x86b   :  { %2939 = vmatpush1.bf16.msra.mxu0 %v2938_v31  ;;  %2159 = vmatprep.mubr.f32.mxu0 %v3174_v7  ;;  %v2952_v7 = vpack.c.bf16 %v2070_v2, %v2068_v62 }
 0x86c   :  { %2334 = vmatmul.mubr.f32.vlgmr.msra.gmra.mrb[24].mxu1 %v3970_v21  ;;  %2941 = vmatprep.subr.bf16.mxu0 %v2940_v36  ;;  %v2069_v21 = vld [vmem:[#allocation4 + $0x90] sm:$0xff] }
 0x86d   :  { %v2954_v53 = vpack.c.bf16 %v2069_v21, %v2067_v26 }
 0x86f   :  { %2943 = vmatpush1.bf16.msra.mxu0 %v2942_v32 }
 0x870   :  { %2945 = vmatprep.subr.bf16.mxu0 %v2944_v34 }
 0x873   :  { %2947 = vmatpush1.bf16.msra.mxu0 %v2946_v48 }
 0x874   :  { %2949 = vmatprep.subr.bf16.mxu0 %v2948_v55 }
 0x877   :  { %2951 = vmatpush1.bf16.msra.mxu0 %v2950_v29 }
 0x878   :  { %2953 = vmatprep.subr.bf16.mxu0 %v2952_v7 }
 0x87b   :  { %2955 = vmatpush1.bf16.msra.mxu0 %v2954_v53 }
 0x87c   :  { %2957 = vmatprep.subr.bf16.mxu0 %v2956_v57 }
 0x87f   :  { %2959 = vmatpush1.bf16.msra.mxu0 %v2958_v0 }
 0x880   :  { %2961 = vmatprep.subr.bf16.mxu0 %v2960_v4 }
 0x883   :  { %2963 = vmatpush1.bf16.msra.mxu0 %v2962_v10 }
 0x884   :  { %2965 = vmatprep.subr.bf16.mxu0 %v2964_v12 }
 0x887   :  { %2967 = vmatpush1.bf16.msra.mxu0 %v2966_v39 }
 0x93d   :  { %v2281_v43 = vpop.f32.mrb[16].mxu0 }
 0x93e   :  { %v2282_v44 = vpop.f32.mrb[17].mxu0 }
 0x93f   :  { %v2283_v52 = vadd.f32 %v2282_v44, %v2281_v43  ;;  %v2046_v45 = vpop.f32.mrb[24].mxu1 }
 0x940   :  { %v2335_v30 = vpop.f32.mrb[25].mxu1 }
 0x941   :  { %v1977_v46 = vadd.f32 %v2283_v52, %v2245_v20 }
 0x943   :  { %v2047_v50 = vadd.f32 %v2046_v45, %v1977_v46 }
 0x945   :  { %v2050_v59 = vmax.f32 %v2047_v50, 0.0 }
 0x947   :  { %2160 = vmatmul.mubr.f32.vlgmr.msra.gmra.mrb[18].mxu0 %v2050_v59 }
 0xa1a   :  { %v2161_v49 = vpop.f32.mrb[18].mxu0 }
 0xa1b   :  { %v2162_v54 = vadd.f32 %v2161_v49, %v2088_v33  ;;  %v2163_v1 = vpop.f32.mrb[19].mxu0 }
 0xa1c   :  { %v2164_v6 = vadd.f32 %v2163_v1, %v2092_v37 }
 0xa1e   :  { %v2168_v14 = vcombine.low %v2162_v54, %v2164_v6 }
 0xa20   :  { %2246 = vst.sshfl [vmem:[#allocation11] sm:$0x33 pattern:$0x76325410] %v2168_v14 }
 0xa21   :  { %3149 = shalt.err (!%p3146_p5)
}
 0xa22   :  { %s4031_s0 = sld [smem:[#allocation27_spill]] }
 0xa28   :  { %s3150_s27 = scalar_lea.hbm %s4031_s0, 64 }
 0xa29   :  { %p3151_p6 = scmp.ne.s32.totalorder %s4031_s0, %s3150_s27  ;;  %p3154_p7 = scmp.lt.u32.totalorder %s3150_s27, %s4031_s0 }
 0xa2b   :  { %p3156_p8 = pnand %p3154_p7, %p3151_p6 }
 0xa2d   :  { %3159 = shalt.err (!%p3156_p8)
}
 0xa2e   :  { %2187 = dma.vmem_to_hbm [thread:$0]  %s2185_s21, 64, %s4031_s0, [#allocation8]  }
 0xa2f   :  { %3168 = dma.done.wait [#allocation8], 64  }
 0xa30   :  { %3169 = vsyncadd [#allocation8], 4294967232 }
 0xa31   :  { %2191 = vsyncpa [#allocation7], 1 }
 0xa32   :  { %2192 = vsyncpa [#allocation8], 1 }
 0xa33   :  { %2193 = vsyncpa [#allocation9], 1 }
 0xa34   :  { %2194 = vsyncmov [#allocation5] }
 0xa37   :  { %s2195_s13 = vpop.sfrf %2194 }
 0xa38   :  { %p2247_p9 = scmp.ne.s32.totalorder %s2195_s13, 0 }
 0xa3a   :  { %2199 = shalt.err (%p2247_p9)  }
 0xa3b   :  { %2201 = vsyncmov [#allocation5 + $0x1] }
 0xa3e   :  { %s2202_s25 = vpop.sfrf %2201 }
 0xa3f   :  { %p2248_p10 = scmp.ne.s32.totalorder %s2202_s25, 0 }
 0xa41   :  { %2206 = shalt.err (%p2248_p10)  }

</bundles_post_ra>
